<compile_context>
chip_gen: v7x
topology: tpu7x:2x2x1
jax: 0.10.0
libtpu: 0.0.40
codegen_flags: <defaults>
</compile_context>

<pallas_src>
import functools

import jax
import jax.numpy as jnp
from jax.experimental import pallas as pl
from jax.experimental.pallas import tpu as pltpu


def _compress_kernel(x_ref, w_ref, b_ref, p_ref, o_ref, *,
                     compress_size, seq_len, d_model):
    # x_ref : (Bt, S, 128) bf16   batch tile, already permuted to (S, 128)
    # w_ref : (128, D)     bf16   linear weight (transposed), grid-resident
    # b_ref : (1, D)       f32    linear bias, grid-resident
    # p_ref : SMEM f32[cs+1]      [conv_w * bn_scale (cs entries), conv_b*bn_scale + bn_shift]
    # o_ref : (Bt, seq_len, D)
    bt, s, _ = x_ref.shape

    # Linear + ReLU on the MXU: (Bt*S, 128) @ (128, D), f32 accumulation.
    x2 = x_ref[...].reshape(bt * s, 128)
    h = jnp.dot(x2, w_ref[...], preferred_element_type=jnp.float32) + b_ref[...]
    h = jnp.maximum(h, 0.0)

    # Strided (compress_size, 1) conv as a small VPU weighted sum (BN already folded in).
    h4 = h.reshape(bt * seq_len, compress_size, d_model)
    conv = h4[:, 0, :] * p_ref[0]
    for k in range(1, compress_size):
        conv = conv + h4[:, k, :] * p_ref[k]
    y = jnp.maximum(conv + p_ref[compress_size], 0.0)         # fused conv-bias+BN + ReLU

    o_ref[...] = y.reshape(bt, seq_len, d_model).astype(o_ref.dtype)


def _choose_batch_tile(B, S, seq_len, d_model, *,
                       vmem_budget_bytes=8 << 20, target_rows=256):
    """Smallest batch tile giving >=target_rows matmul rows (and >=2 grid steps when possible),
    bounded by a conservative VMEM budget (double-buffered in/out + resident weights)."""
    def working_set(bt):
        x_blk = bt * S * 128 * 2                      # bf16 input block
        o_blk = bt * seq_len * d_model * 4            # f32 output block
        resident = 128 * d_model * 2 + d_model * 4    # W (bf16) + bias (f32)
        return 2 * (x_blk + o_blk) + resident

    divisors = [d for d in range(1, B + 1) if B % d == 0]
    fitting = [d for d in divisors if working_set(d) <= vmem_budget_bytes] or [1]
    for d in fitting:                                 # prefer keeping >1 grid step so both
        if d * S >= target_rows and B // d >= 2:      # v7x TensorCores / megacore stay busy
            return d
    for d in fitting:                                 # otherwise just reach target_rows
        if d * S >= target_rows:
            return d
    return fitting[-1]                                # largest tile that fits VMEM


def compress_module(x, lin_w, lin_b, conv_w, conv_b,
                    bn_gamma, bn_beta, bn_mean, bn_var,
                    *, compress_size, seq_len, eps=1e-5, out_dtype=jnp.float32):
    B, F, S = x.shape
    assert F == 128, "Linear is hardwired to 128 input features"
    assert S == compress_size * seq_len, (
        f"Input size {S} does not match compress_size {compress_size} and seq_len {seq_len}")
    d_model = lin_w.shape[0]
    assert d_model % 128 == 0, "d_model should be a lane (128) multiple for dense stores"

    # ---- glue / parameter layout (plain JAX; transpose + bf16 cast fuse into one XLA op) ----
    x_perm = jnp.transpose(x, (0, 2, 1)).astype(jnp.bfloat16)    # (B, S, 128) bf16
    w = jnp.transpose(lin_w).astype(jnp.bfloat16)                # (128, d_model) bf16
    b = lin_b.reshape(1, d_model).astype(jnp.float32)

    # Fold eval-mode BatchNorm into the conv: wk' = wk*scale, bias' = conv_b*scale + shift.
    scale = bn_gamma[0] / jnp.sqrt(bn_var[0] + eps)
    shift = bn_beta[0] - bn_mean[0] * scale
    wk = conv_w.reshape(compress_size).astype(jnp.float32) * scale
    fused_bias = conv_b[0] * scale + shift
    params = jnp.concatenate([wk, jnp.reshape(fused_bias, (1,))]).astype(jnp.float32)

    Bt = _choose_batch_tile(B, S, seq_len, d_model)
    grid = (B // Bt,)

    kernel = functools.partial(_compress_kernel, compress_size=compress_size,
                               seq_len=seq_len, d_model=d_model)

    flops = 2 * B * S * 128 * d_model + B * S * d_model * (compress_size + 3)
    bytes_accessed = (x_perm.size * 2 + w.size * 2 + b.size * 4 + params.size * 4
                      + B * seq_len * d_model * jnp.dtype(out_dtype).itemsize)

    # ---- Pallas kernel call ----
    return pl.pallas_call(
        kernel,
        out_shape=jax.ShapeDtypeStruct((B, seq_len, d_model), out_dtype),
        grid_spec=pltpu.PrefetchScalarGridSpec(
            num_scalar_prefetch=0,
            grid=grid,
            in_specs=[
                pl.BlockSpec((Bt, S, 128), lambda bi: (bi, 0, 0)),      # x (batch tile)
                pl.BlockSpec((128, d_model), lambda bi: (0, 0)),        # linear W (resident)
                pl.BlockSpec((1, d_model), lambda bi: (0, 0)),          # linear bias
                pl.BlockSpec(memory_space=pltpu.MemorySpace.SMEM),      # folded conv/BN params
            ],
            out_specs=pl.BlockSpec((Bt, seq_len, d_model), lambda bi: (bi, 0, 0)),
        ),
        compiler_params=pltpu.CompilerParams(dimension_semantics=("parallel",)),
        cost_estimate=pl.CostEstimate(flops=flops, transcendentals=0,
                                      bytes_accessed=bytes_accessed),
    )(x_perm, w, b, params)


def ref_forward(x, lin_w, lin_b, conv_w, conv_b, bn_gamma, bn_beta, bn_mean, bn_var,
                *, compress_size, seq_len, eps=1e-5):
    B = x.shape[0]
    d_model = lin_w.shape[0]
    xp = jnp.transpose(x, (0, 2, 1))                                    # (B, S, 128)
    h = jnp.maximum(xp @ lin_w.T + lin_b, 0.0)                          # (B, S, D)
    h4 = h.reshape(B, seq_len, compress_size, d_model)
    conv = jnp.einsum("btkd,k->btd", h4, conv_w.reshape(-1)) + conv_b[0]
    y = (conv - bn_mean[0]) / jnp.sqrt(bn_var[0] + eps) * bn_gamma[0] + bn_beta[0]
    return jnp.maximum(y, 0.0)


if __name__ == "__main__":
    B, compress_size, seq_len, d_model = 16, 4, 8, 128
    S = compress_size * seq_len                                          # 32

    key = jax.random.PRNGKey(0)
    k = jax.random.split(key, 5)
    x = jax.random.normal(k[0], (B, 128, S), jnp.float32)                # PyTorch input layout
    lin_w = jax.random.normal(k[1], (d_model, 128), jnp.float32) * 0.05  # nn.Linear(128, d_model)
    lin_b = jax.random.normal(k[2], (d_model,), jnp.float32) * 0.05
    conv_w = jax.random.normal(k[3], (1, 1, compress_size, 1), jnp.float32) * 0.5
    conv_b = jax.random.normal(k[4], (1,), jnp.float32) * 0.1
    bn_gamma = jnp.full((1,), 1.25, jnp.float32)                         # deterministic BN params
    bn_beta = jnp.full((1,), 0.10, jnp.float32)
    bn_mean = jnp.full((1,), 0.05, jnp.float32)
    bn_var = jnp.full((1,), 0.80, jnp.float32)

    out = compress_module(x, lin_w, lin_b, conv_w, conv_b,
                          bn_gamma, bn_beta, bn_mean, bn_var,
                          compress_size=compress_size, seq_len=seq_len)
    jax.block_until_ready(out)

    ref = ref_forward(x, lin_w, lin_b, conv_w, conv_b,
                      bn_gamma, bn_beta, bn_mean, bn_var,
                      compress_size=compress_size, seq_len=seq_len)

    assert out.shape == (B, seq_len, d_model), out.shape
    # bf16 matmul inputs (f32 accumulation) -> compare against the f32 reference loosely.
    max_err = float(jnp.max(jnp.abs(out - ref)))
    assert jnp.allclose(out, ref, atol=5e-2, rtol=5e-2), max_err
    print("KERNEL_OK")
</pallas_src>

<mosaic_0001>
module attributes {stable_mosaic.version = 11 : i64} {
  func.func @_compress_kernel(%arg0: i32, %arg1: memref<8x32x128xbf16, #tpu.memory_space<vmem>>, %arg2: memref<128x128xbf16, #tpu.memory_space<vmem>>, %arg3: memref<1x128xf32, #tpu.memory_space<vmem>>, %arg4: memref<5xf32, #tpu.memory_space<smem>>, %arg5: memref<8x8x128xf32, #tpu.memory_space<vmem>>) attributes {dimension_semantics = [#tpu.dimension_semantics<parallel>], iteration_bounds = array<i64: 2>, scalar_prefetch = 0 : i64, scratch_operands = 0 : i64, tpu.core_type = #tpu.core_type<tc>, window_params = [{transform_indices = @transform_0, window_bounds = array<i64: 8, 32, 128>}, {pipeline_mode = #tpu.pipeline_mode<synchronous>, transform_indices = @transform_1, window_bounds = array<i64: 128, 128>}, {pipeline_mode = #tpu.pipeline_mode<synchronous>, transform_indices = @transform_2, window_bounds = array<i64: 1, 128>}, {transform_indices = @transform_3, window_bounds = array<i64: 5>}, {transform_indices = @transform_4, window_bounds = array<i64: 8, 8, 128>}]} {
    %c0 = arith.constant 0 : index
    %c0_0 = arith.constant 0 : index
    %c0_1 = arith.constant 0 : index
    %0 = vector.load %arg1[%c0, %c0_0, %c0_1] : memref<8x32x128xbf16, #tpu.memory_space<vmem>>, vector<8x32x128xbf16>
    %1 = vector.shape_cast %0 : vector<8x32x128xbf16> to vector<256x128xbf16>
    %c0_2 = arith.constant 0 : index
    %c0_3 = arith.constant 0 : index
    %2 = vector.load %arg2[%c0_2, %c0_3] : memref<128x128xbf16, #tpu.memory_space<vmem>>, vector<128x128xbf16>
    %cst = arith.constant dense<0.000000e+00> : vector<256x128xf32>
    %3 = tpu.matmul %1, %2, %cst {dimension_numbers = #tpu.dot_dimension_numbers<[1], [0], [0], [1], [0, 0, 1, 1], [], []>} : vector<256x128xbf16>, vector<128x128xbf16>, vector<256x128xf32> -> vector<256x128xf32>
    %c0_4 = arith.constant 0 : index
    %c0_5 = arith.constant 0 : index
    %4 = vector.load %arg3[%c0_4, %c0_5] : memref<1x128xf32, #tpu.memory_space<vmem>>, vector<1x128xf32>
    %5 = vector.broadcast %4 : vector<1x128xf32> to vector<256x128xf32>
    %6 = arith.addf %3, %5 : vector<256x128xf32>
    %cst_6 = arith.constant 0.000000e+00 : f32
    %7 = vector.broadcast %cst_6 : f32 to vector<256x128xf32>
    %8 = arith.maximumf %6, %7 : vector<256x128xf32>
    %9 = vector.shape_cast %8 : vector<256x128xf32> to vector<64x4x128xf32>
    %10 = vector.extract_strided_slice %9 {offsets = [0, 0, 0], sizes = [64, 1, 128], strides = [1, 1, 1]} : vector<64x4x128xf32> to vector<64x1x128xf32>
    %11 = vector.shape_cast %10 : vector<64x1x128xf32> to vector<64x128xf32>
    %c0_7 = arith.constant 0 : index
    %12 = memref.load %arg4[%c0_7] : memref<5xf32, #tpu.memory_space<smem>>
    %13 = vector.broadcast %12 : f32 to vector<64x128xf32>
    %14 = arith.mulf %11, %13 : vector<64x128xf32>
    %15 = vector.extract_strided_slice %9 {offsets = [0, 1, 0], sizes = [64, 1, 128], strides = [1, 1, 1]} : vector<64x4x128xf32> to vector<64x1x128xf32>
    %16 = vector.shape_cast %15 : vector<64x1x128xf32> to vector<64x128xf32>
    %c1 = arith.constant 1 : index
    %17 = memref.load %arg4[%c1] : memref<5xf32, #tpu.memory_space<smem>>
    %18 = vector.broadcast %17 : f32 to vector<64x128xf32>
    %19 = arith.mulf %16, %18 : vector<64x128xf32>
    %20 = arith.addf %14, %19 : vector<64x128xf32>
    %21 = vector.extract_strided_slice %9 {offsets = [0, 2, 0], sizes = [64, 1, 128], strides = [1, 1, 1]} : vector<64x4x128xf32> to vector<64x1x128xf32>
    %22 = vector.shape_cast %21 : vector<64x1x128xf32> to vector<64x128xf32>
    %c2 = arith.constant 2 : index
    %23 = memref.load %arg4[%c2] : memref<5xf32, #tpu.memory_space<smem>>
    %24 = vector.broadcast %23 : f32 to vector<64x128xf32>
    %25 = arith.mulf %22, %24 : vector<64x128xf32>
    %26 = arith.addf %20, %25 : vector<64x128xf32>
    %27 = vector.extract_strided_slice %9 {offsets = [0, 3, 0], sizes = [64, 1, 128], strides = [1, 1, 1]} : vector<64x4x128xf32> to vector<64x1x128xf32>
    %28 = vector.shape_cast %27 : vector<64x1x128xf32> to vector<64x128xf32>
    %c3 = arith.constant 3 : index
    %29 = memref.load %arg4[%c3] : memref<5xf32, #tpu.memory_space<smem>>
    %30 = vector.broadcast %29 : f32 to vector<64x128xf32>
    %31 = arith.mulf %28, %30 : vector<64x128xf32>
    %32 = arith.addf %26, %31 : vector<64x128xf32>
    %c4 = arith.constant 4 : index
    %33 = memref.load %arg4[%c4] : memref<5xf32, #tpu.memory_space<smem>>
    %34 = vector.broadcast %33 : f32 to vector<64x128xf32>
    %35 = arith.addf %32, %34 : vector<64x128xf32>
    %cst_8 = arith.constant 0.000000e+00 : f32
    %36 = vector.broadcast %cst_8 : f32 to vector<64x128xf32>
    %37 = arith.maximumf %35, %36 : vector<64x128xf32>
    %38 = vector.shape_cast %37 : vector<64x128xf32> to vector<8x8x128xf32>
    %c0_9 = arith.constant 0 : index
    %c0_10 = arith.constant 0 : index
    %c0_11 = arith.constant 0 : index
    %39 = vector.load %arg5[%c0_9, %c0_10, %c0_11] : memref<8x8x128xf32, #tpu.memory_space<vmem>>, vector<8x8x128xf32>
    tpu.vector_store %arg5[%c0_9, %c0_10, %c0_11], %38 {strides = array<i32>} : memref<8x8x128xf32, #tpu.memory_space<vmem>>, vector<8x8x128xf32>,
    return
  }
  func.func @transform_0(%arg0: i32) -> (i32, i32, i32) {
    %c0_i32 = arith.constant 0 : i32
    %c0_i32_0 = arith.constant 0 : i32
    %c0_i32_1 = arith.constant 0 : i32
    return %arg0, %c0_i32, %c0_i32_0 : i32, i32, i32
  }
  func.func @transform_1(%arg0: i32) -> (i32, i32) {
    %c0_i32 = arith.constant 0 : i32
    %c0_i32_0 = arith.constant 0 : i32
    %c0_i32_1 = arith.constant 0 : i32
    return %c0_i32, %c0_i32_0 : i32, i32
  }
  func.func @transform_2(%arg0: i32) -> (i32, i32) {
    %c0_i32 = arith.constant 0 : i32
    %c0_i32_0 = arith.constant 0 : i32
    %c0_i32_1 = arith.constant 0 : i32
    return %c0_i32, %c0_i32_0 : i32, i32
  }
  func.func @transform_3(%arg0: i32) -> i32 {
    %c0_i32 = arith.constant 0 : i32
    %c0_i32_0 = arith.constant 0 : i32
    return %c0_i32 : i32
  }
  func.func @transform_4(%arg0: i32) -> (i32, i32, i32) {
    %c0_i32 = arith.constant 0 : i32
    %c0_i32_0 = arith.constant 0 : i32
    %c0_i32_1 = arith.constant 0 : i32
    return %arg0, %c0_i32, %c0_i32_0 : i32, i32, i32
  }
}

</mosaic_0001>

<bundles_post_ra>
// kernel: tpu_custom_call.1
= control target key start
LH: loop header
LB: loop body
LE: loop exit
PB: predicated region body
PF: predicated region fallthrough
CT: control target
= control target key end

     0   :  { %9 = vsyncpa [#allocation3], 0  ;;  %s4193_s0 = inlined_call_operand.hbm [shape: bf16[16,32,128], index: 0, kind: input, shape index: {}]   ;;  %s4194_s1 = inlined_call_operand.hbm [shape: bf16[128,128], index: 1, kind: input, shape index: {}]   ;;  %s4195_s2 = inlined_call_operand.vmem [shape: f32[1,128], index: 2, kind: input, shape index: {}]   ;;  %s4196_s3 = inlined_call_operand.vmem [shape: f32[5], index: 3, kind: input, shape index: {}]   ;;  %s4197_s4 = inlined_call_operand.hbm [shape: f32[16,8,128], index: 4, kind: output, shape index: {}]  }
   0x1   :  { %11 = vsyncpa [#allocation3 + $0x1], 0 }
   0x2   :  { %12 = vsyncpa [#allocation7], 0 }
   0x3   :  { %13 = vsyncpa [#allocation5], 0 }
   0x4   :  { %14 = vsyncpa [#allocation4], 0 }
   0x5   :  { %16 = vsyncpa [#allocation4 + $0x1], 0  ;;  %s3208_s15 = smov 0   ;;  %s3210_s16 = smov 0  }
   0x6   :  { %s3212_s17 = smov 0   ;;  %s3214_s18 = smov 0  }
   0x7 LB: > { %s3229_s19 = sadd.s32 4294967295, %s3173_s18   ;;  %s2599_s20 = sadd.s32 4294967294, %s3173_s18   ;;  %s3173_s18 = sphi %s3214_s18, %s4219_s18   ;;  %s3169_s17 = sphi %s3212_s17, %s4218_s17   ;;  %s3165_s16 = sphi %s3210_s16, %s4217_s16   ;;  %s3161_s15 = sphi %s3208_s15, %s4216_s15  }
   0x8   : > { %p42_p0 = scmp.ne.s32.totalorder %s3165_s16, %s3161_s15  ;;  %p4198_p1 = scmp.eq.s32.totalorder %s3229_s19, 0 }
   0x9   : > { %p135_p3 = scmp.eq.s32.totalorder %s2599_s20, 1  ;;  %p2600_p5 = scmp.ge.s32.totalorder %s3173_s18, 1 }
   0xa   : > { %p3238_p4 = por %p4198_p1, %p42_p0  ;;  %p142_p7 = scmp.lt.s32.totalorder %s3173_s18, 3 }
   0xb   : > { %p3243_p6 = por %p135_p3, %p42_p0  ;;  %s3175_s24 = smov [#allocation6]  }
   0xc   : > { %s4201_s21 = scalar_select %p3238_p4, 1, 0 }
   0xd   : > { %s4202_s22 = scalar_select %p3243_p6, 1, 0 }
   0xe   : > { %p3248_p8 = pnand %p2600_p5, %p142_p7  ;;  %s154_s25 = sshll.u32 %s3175_s24, 4  ;;  %s155_s25 = int_to_ptr.vmem [resolvable:$true] %s154_s25 }
   0xf   : > { %s171_s28 = sshll.u32 %s4196_s3, 4  ;;  %s3026_s6 = scalar_lea.hbm %s4194_s1, 1024  ;;  %s3264_s28 = int_to_ptr.vmem [resolvable:$true] %s171_s28 }
  0x10   : > { %s4203_s23 = scalar_select %p3248_p8, 1, 0 }
  0x11   : > { %p2942_p9 = pneg %p3248_p8  ;;  %p3027_p12 = scmp.ne.s32.totalorder %s4194_s1, %s3026_s6 }
  0x12   : > { %p3033_p5 = scmp.lt.u32.totalorder %s3026_s6, %s4194_s1 }
  0x13   : > { %p3260_p11 = pnand %p2942_p9, %p4198_p1 }
  0x15   : > { %p3028_p13 = pneg %p3260_p11 }
  0x17   : > { %p3029_p0 = pnand %p3028_p13, %p3027_p12 }
  0x19   : > { %p3030_p3 = pneg %p3029_p0 }
  0x1b   : > { %p3035_p7 = pnand %p3033_p5, %p3030_p3 }
  0x1d   : > { %3038 = shalt.err (!%p3035_p7)
}
  0x1e   : > { %s3039_s11 = scalar_lea.vmem %s155_s25, 1024  ;;  %p3047_p2 = scmp.lt.s32.totalorder %s155_s25, %s155_s25 }
  0x1f   : > { %p3040_p9 = scmp.ne.s32.totalorder %s155_s25, %s3039_s11  ;;  %p3048_p6 = scmp.lt.s32.totalorder %s3039_s11, %s3039_s11 }
  0x21   : > { %p3042_p10 = pnand %p3040_p9, %p3028_p13  ;;  %p3049_p4 = por %p3048_p6, %p3047_p2 }
  0x23   : > { %p3043_p1 = pneg %p3042_p10 }
  0x25   : > { %p3050_p8 = pnand %p3049_p4, %p3043_p1 }
  0x27   : > { %3053 = shalt.err (!%p3050_p8)
}
  0x28   : > { %s3176_s12 = smov 64   ;;  %s3177_s13 = smov 4  }
  0x29   : > { %2945 = dma.hbm_to_vmem [thread:$0]  (!%p3260_p11), %s4194_s1, 1024, %s155_s25, [#allocation7], %s3176_s12, %s3176_s12, %s3177_s13  }
  0x2a   : > { %s3054_s24 = scalar_lea.vmem %s3264_s28, 16  ;;  %p3062_p4 = scmp.lt.s32.totalorder %s3264_s28, %s3264_s28 }
  0x2b   : > { %p3055_p10 = scmp.ne.s32.totalorder %s3264_s28, %s3054_s24  ;;  %p3063_p6 = scmp.lt.s32.totalorder %s3054_s24, %s3054_s24 }
  0x2d   : > { %p3057_p1 = pnand %p3055_p10, %p3028_p13  ;;  %p3064_p8 = por %p3063_p6, %p3062_p4 }
  0x2f   : > { %p3058_p2 = pneg %p3057_p1 }
  0x31   : > { %p3065_p12 = pnand %p3064_p8, %p3058_p2 }
  0x33   : > { %3068 = shalt.err (!%p3065_p12)
}
  0x34   : > { %s3178_s26 = smov [#allocation8]   ;;  %s3302_s25 = sadd.s32 1, %s3173_s18  }
  0x35   : > { %2948 = dma.vmem_to_smem (!%p3260_p11), %s3264_s28, 16, %s3178_s26, [#allocation5]  }
  0x36   : > { %s29_s27 = sadd.s32 1, %s3169_s17  ;;  %s26_s30 = ssub.s32 %s3173_s18, %s3302_s25 }
  0x37   : > { %p36_p13 = scmp.ne.s32.totalorder %s3169_s17, %s3165_s16  ;;  %p27_p0 = scmp.eq.s32.totalorder %s26_s30, 0 }
  0x38   : > { %p37_p3 = scmp.eq.s32.totalorder %s3173_s18, 0  ;;  %p4205_p5 = scmp.eq.s32.totalorder %s3229_s19, 1 }
  0x39   : > { %p2959_p9 = scmp.lt.s32.totalorder %s3173_s18, 2  ;;  %s182_s6 = sand.u32 1, %s3169_s17  }
  0x3a   : > { %p3312_p7 = por %p4205_p5, %p36_p13  ;;  %p38_p10 = por %p37_p3, %p36_p13 }
  0x3b   : > { %s3318_s5 = scalar_select %p27_p0, %s3169_s17, %s29_s27  }
  0x3c   : > { %s2604_s7 = sshll.u32 %s182_s6, 7  ;;  %s2840_s28 = sshll.u32 %s3173_s18, 11 }
  0x3d   : > { %s3325_s10 = scalar_lea.hbm %s4193_s0, %s2840_s28  ;;  %s186_s11 = scalar_lea.vmem [#allocation2], %s2604_s7 }
  0x3e   : > { %s194_s14 = sshll.u32 %s186_s11, 4  ;;  %p3329_p11 = pnand %p2959_p9, %p38_p10  ;;  %s3327_s14 = int_to_ptr.vmem [resolvable:$true] %s194_s14 }
  0x3f   : > { %s3333_s24 = scalar_lea.sflag [#allocation3], %s182_s6  ;;  %s3069_s26 = scalar_lea.hbm %s3325_s10, 2048 }
  0x40   : > { %p3070_p1 = scmp.ne.s32.totalorder %s3325_s10, %s3069_s26  ;;  %p3071_p2 = pneg %p3329_p11 }
  0x41   : > { %s3074_s7 = scalar_lea.hbm %s4193_s0, 4096  ;;  %p3075_p8 = scmp.lt.u32.totalorder %s3325_s10, %s4193_s0 }
  0x42   : > { %p3072_p4 = pnand %p3071_p2, %p3070_p1  ;;  %p3076_p12 = scmp.lt.u32.totalorder %s3074_s7, %s3069_s26 }
  0x43   : > { %p3078_p0 = scmp.lt.u32.totalorder %s3069_s26, %s3325_s10 }
  0x44   : > { %p3073_p6 = pneg %p3072_p4  ;;  %p3077_p13 = por %p3076_p12, %p3075_p8 }
  0x46   : > { %p3079_p3 = por %p3078_p0, %p3077_p13 }
  0x48   : > { %p3080_p5 = pnand %p3079_p3, %p3073_p6 }
  0x4a   : > { %3083 = shalt.err (!%p3080_p5)
}
  0x4b   : > { %s3084_s6 = scalar_lea.vmem %s3327_s14, 2048  ;;  %s3179_s9 = smov [#allocation2]  }
  0x4c   : > { %p3085_p9 = scmp.ne.s32.totalorder %s3327_s14, %s3084_s6  ;;  %s3089_s11 = sshll.u32 %s3179_s9, 4  ;;  %s3090_s11 = int_to_ptr.vmem [resolvable:$false] %s3089_s11 }
  0x4d   : > { %s3091_s27 = scalar_lea.vmem %s3090_s11, 4096  ;;  %p3092_p4 = scmp.lt.s32.totalorder %s3327_s14, %s3090_s11 }
  0x4e   : > { %p3087_p10 = pnand %p3085_p9, %p3071_p2  ;;  %p3093_p8 = scmp.lt.s32.totalorder %s3091_s27, %s3084_s6 }
  0x50   : > { %p3088_p1 = pneg %p3087_p10  ;;  %p3094_p12 = por %p3093_p8, %p3092_p4 }
  0x52   : > { %p3095_p13 = pnand %p3094_p12, %p3088_p1 }
  0x54   : > { %3098 = shalt.err (!%p3095_p13)
}
  0x55   : > { %2952 = dma.hbm_to_vmem [thread:$0]  (!%p3329_p11), %s3325_s10, 2048, %s3327_s14, %s3333_s24, %s3176_s12, %s3176_s12, %s3177_s13  }
  0x56   : > { %p4208_p2 = scmp.ne.s32.totalorder %s4203_s23, 0 }
  0x57   : > { %s3367_s26 = sand.u32 (!%p4208_p2), 1, %s3165_s16   ;;  %p4209_p6 = scmp.ne.s32.totalorder (!%p4208_p2), %s4201_s21, 0 }
  0x58   : > { %206 = sbr.rel (%p4208_p2) target bundleno = 617 (0x269), region = 36  ;;  %s2609_s30 = sshll.u32 (!%p4208_p2), %s3367_s26, 7 }
  0x59   : > { %s209_s7 = scalar_lea.sflag (!%p4208_p2), [#allocation3], %s3367_s26  ;;  %s3371_s28 = scalar_lea.vmem (!%p4208_p2), [#allocation2], %s2609_s30 }
  0x5f   : > { %3144 = dma.done.wait (%p4209_p6), %s209_s7, 2048  }
  0x60   : > { %3146 = vsyncadd (%p4209_p6), %s209_s7, 4294965248  ;;  %p4210_p11 = scmp.eq.s32.totalorder %s3229_s19, 0 }
  0x62   : > { %3148 = dma.done.wait (%p4210_p11), [#allocation7], 1024   ;;  %p4211_p0 = pmov %p4210_p11 }
  0x64   : > { %3150 = vsyncadd (%p4211_p0), [#allocation7], 4294966272  ;;  %p4212_p3 = pmov %p4211_p0 }
  0x65   : > { %p4213_p5 = pmov %p4211_p0 }
  0x66   : > { %3152 = dma.done.wait (%p4212_p3), [#allocation5], 16  }
  0x67   : > { %3154 = vsyncadd (%p4213_p5), [#allocation5], 4294967280 }
  0x68   : > { %225 = sfence }
  0x69   : > { %v3001_v0 = vld [vmem:[#allocation6] sm:$0xff]   ;;  %v3002_v1 = vld [vmem:[#allocation6 + $0x8] sm:$0xff]   ;;  %v3003_v2 = vld [vmem:[#allocation6 + $0x10] sm:$0xff]   ;;  %s737_s21 = sld [smem:[#allocation8]]  ;;  %s2638_s23 = sld [smem:[#allocation8 + $0x1]]  ;;  %v2155_v24 = vlaneseq  ;;  %vm2411_vm0 = vcmask 1041409  }
  0x6a   : > { %2866 = vmatprep.subr.bf16.mxu0 %v3001_v0  ;;  %2914 = vmatprep.subr.bf16.mxu1 %v3001_v0  ;;  %v3004_v3 = vld [vmem:[#allocation6 + $0x18] sm:$0xff]   ;;  %v3009_v4 = vld [vmem:[%s3371_s28] sm:$0xff]   ;;  %v3006_v7 = vld [vmem:[#allocation6 + $0x28] sm:$0xff]   ;;  %s2703_s12 = sld [smem:[#allocation8 + $0x2]]  ;;  %s2768_s13 = sld [smem:[#allocation8 + $0x3]]  ;;  %vm2413_vm1 = vcmask 1042434  }
  0x6b   : > { %2867 = vmatpush3.bf16.msra.mxu0 %v3001_v0  ;;  %2922 = vmatpush3.bf16.msra.mxu1 %v3001_v0  ;;  %v3010_v5 = vld [vmem:[%s3371_s28 + $0x40] sm:$0xff]   ;;  %v3007_v8 = vld [vmem:[#allocation6 + $0x30] sm:$0xff]   ;;  %v3008_v9 = vld [vmem:[#allocation6 + $0x38] sm:$0xff]   ;;  %s2833_s10 = sld [smem:[#allocation8 + $0x4]]  ;;  %v2156_v27 = vshrl.u32 %v2155_v24, 7  ;;  %vm2415_vm2 = vcmask 1043459  }
  0x6c   : > { %2868 = vmatprep.subr.bf16.mxu0 %v3002_v1  ;;  %2915 = vmatprep.subr.bf16.mxu1 %v3002_v1  ;;  %v3005_v6 = vld [vmem:[#allocation6 + $0x20] sm:$0xff]   ;;  %v3011_v10 = vld [vmem:[%s3371_s28 + $0x8] sm:$0xff]   ;;  %v3013_v12 = vld [vmem:[%s3371_s28 + $0x10] sm:$0xff]   ;;  %vm2417_vm3 = vcmask 1044484   ;;  %vm2419_vm4 = vcmask 1045509   ;;  %vm2421_vm5 = vcmask 1046534  }
  0x6d   : > { %2882 = vmatprep.mubr.bf16.mxu0 %v3009_v4  ;;  %2898 = vmatprep.mubr.bf16.mxu1 %v3010_v5  ;;  %v3012_v11 = vld [vmem:[%s3371_s28 + $0x48] sm:$0xff]   ;;  %v3014_v13 = vld [vmem:[%s3371_s28 + $0x50] sm:$0xff]   ;;  %v3015_v14 = vld [vmem:[%s3371_s28 + $0x18] sm:$0xff]   ;;  %v3424_v46 = vsub.s32 0, %v2156_v27  ;;  %vm2423_vm6 = vcmask 1047559   ;;  %s2612_s24 = sshll.u32 %s3367_s26, 6 }
  0x6e   : > { %v3016_v15 = vld [vmem:[%s3371_s28 + $0x58] sm:$0xff]   ;;  %v3017_v16 = vld [vmem:[%s3371_s28 + $0x20] sm:$0xff]   ;;  %v3019_v18 = vld [vmem:[%s3371_s28 + $0x28] sm:$0xff]   ;;  %s3642_s8 = scalar_lea.vmem [#allocation9], %s2612_s24  ;;  %s2841_s11 = sshll.u32 %s3229_s19, 10 }
  0x6f   : > { %2869 = vmatpush3.bf16.msra.mxu0 %v3002_v1  ;;  %2923 = vmatpush3.bf16.msra.mxu1 %v3002_v1  ;;  %v3018_v17 = vld [vmem:[%s3371_s28 + $0x60] sm:$0xff]   ;;  %v3020_v19 = vld [vmem:[%s3371_s28 + $0x68] sm:$0xff]   ;;  %v3021_v20 = vld [vmem:[%s3371_s28 + $0x30] sm:$0xff]   ;;  %v3407_v30 = vstv %s737_s21  ;;  %s2504_s27 = sshll.u32 %s3642_s8, 4  ;;  %s2491_s19 = scalar_lea.sflag [#allocation4], %s3367_s26  ;;  %s4146_s27 = int_to_ptr.vmem [resolvable:$true] %s2504_s27 }
  0x70   : > { %2870 = vmatprep.subr.bf16.mxu0 %v3003_v2  ;;  %2916 = vmatprep.subr.bf16.mxu1 %v3003_v2  ;;  %v3022_v21 = vld [vmem:[%s3371_s28 + $0x70] sm:$0xff]   ;;  %v3023_v22 = vld [vmem:[%s3371_s28 + $0x38] sm:$0xff]   ;;  %v3404_v25 = vld [vmem:[%s4195_s2] ss:$0 sm:$0xff]  ;;  %v3410_v34 = vstv %s2638_s23  ;;  %s3099_s21 = scalar_lea.vmem %s4146_s27, 1024  ;;  %s3180_s23 = smov [#allocation9]  }
  0x71   : > { %v3024_v23 = vld [vmem:[%s3371_s28 + $0x78] sm:$0xff]   ;;  %v3412_v35 = vstv %s2703_s12  ;;  %v3416_v41 = vstv %s2768_s13  ;;  %v3418_v42 = vstv %s2833_s10  ;;  %s4144_s28 = scalar_lea.hbm %s4197_s4, %s2841_s11  ;;  %p3100_p9 = scmp.ne.s32.totalorder %s4146_s27, %s3099_s21 }
  0x72   : > { %s3103_s12 = sshll.u32 %s3180_s23, 4  ;;  %s3104_s12 = int_to_ptr.vmem [resolvable:$false] %s3103_s12 }
  0x73   : > { %2871 = vmatpush3.bf16.msra.mxu0 %v3003_v2  ;;  %2924 = vmatpush3.bf16.msra.mxu1 %v3003_v2  ;;  %p3101_p10 = pnand %p3100_p9, %p3312_p7  ;;  %s3105_s13 = scalar_lea.vmem %s3104_s12, 2048 }
  0x74   : > { %2872 = vmatprep.subr.bf16.mxu0 %v3004_v3  ;;  %2917 = vmatprep.subr.bf16.mxu1 %v3004_v3  ;;  %p3106_p4 = scmp.lt.s32.totalorder %s4146_s27, %s3104_s12  ;;  %p3107_p8 = scmp.lt.s32.totalorder %s3105_s13, %s3099_s21 }
  0x75   : > { %p3102_p1 = pneg %p3101_p10 }
  0x76   : > { %p3108_p12 = por %p3107_p8, %p3106_p4 }
  0x77   : > { %2873 = vmatpush3.bf16.msra.mxu0 %v3004_v3  ;;  %2925 = vmatpush3.bf16.msra.mxu1 %v3004_v3 }
  0x78   : > { %2874 = vmatprep.subr.bf16.mxu0 %v3005_v6  ;;  %2918 = vmatprep.subr.bf16.mxu1 %v3005_v6  ;;  %p3109_p13 = pnand %p3108_p12, %p3102_p1 }
  0x7b   : > { %2875 = vmatpush3.bf16.msra.mxu0 %v3005_v6  ;;  %2926 = vmatpush3.bf16.msra.mxu1 %v3005_v6 }
  0x7c   : > { %2876 = vmatprep.subr.bf16.mxu0 %v3006_v7  ;;  %2919 = vmatprep.subr.bf16.mxu1 %v3006_v7 }
  0x7f   : > { %2877 = vmatpush3.bf16.msra.mxu0 %v3006_v7  ;;  %2927 = vmatpush3.bf16.msra.mxu1 %v3006_v7 }
  0x80   : > { %2878 = vmatprep.subr.bf16.mxu0 %v3007_v8  ;;  %2920 = vmatprep.subr.bf16.mxu1 %v3007_v8 }
  0x83   : > { %2879 = vmatpush3.bf16.msra.mxu0 %v3007_v8  ;;  %2928 = vmatpush3.bf16.msra.mxu1 %v3007_v8 }
  0x84   : > { %2880 = vmatprep.subr.bf16.mxu0 %v3008_v9  ;;  %2921 = vmatprep.subr.bf16.mxu1 %v3008_v9 }
  0x87   : > { %2881 = vmatpush3.bf16.msra.mxu0 %v3008_v9  ;;  %2929 = vmatpush3.bf16.msra.mxu1 %v3008_v9 }
  0x8a   : > { %2883 = vmatmul.mubr.bf16.vlgmr.msra.gmra.mrb[0].mxu0 %v3011_v10  ;;  %2899 = vmatmul.mubr.bf16.vlgmr.msra.gmra.mrb[0].mxu1 %v3012_v11 }
  0x8b   : > { %2886 = vmatprep.mubr.bf16.mxu0 %v3013_v12  ;;  %2902 = vmatprep.mubr.bf16.mxu1 %v3014_v13 }
  0x92   : > { %2887 = vmatmul.mubr.bf16.gmra.mrb[4].mxu0 %v3015_v14  ;;  %2903 = vmatmul.mubr.bf16.gmra.mrb[4].mxu1 %v3016_v15 }
  0x93   : > { %2890 = vmatprep.mubr.bf16.mxu0 %v3017_v16  ;;  %2906 = vmatprep.mubr.bf16.mxu1 %v3018_v17 }
  0x9a   : > { %2891 = vmatmul.mubr.bf16.gmra.mrb[8].mxu0 %v3019_v18  ;;  %2907 = vmatmul.mubr.bf16.gmra.mrb[8].mxu1 %v3020_v19 }
  0x9b   : > { %2894 = vmatprep.mubr.bf16.mxu0 %v3021_v20  ;;  %2910 = vmatprep.mubr.bf16.mxu1 %v3022_v21 }
  0xa2   : > { %2895 = vmatmul.mubr.bf16.gmra.mrb[12].mxu0 %v3023_v22  ;;  %2911 = vmatmul.mubr.bf16.gmra.mrb[12].mxu1 %v3024_v23 }
 0x15d   : > { %v2884_v26 = vpop.f32.mrb[0].mxu0  ;;  %v2900_v28 = vpop.f32.mrb[0].mxu1 }
 0x15e   : > { %v491_v29 = vadd.f32 %v2884_v26, %v3404_v25  ;;  %v555_v31 = vadd.f32 %v2900_v28, %v3404_v25  ;;  %v482_v32 = vpop.f32.mrb[1].mxu0  ;;  %v546_v33 = vpop.f32.mrb[1].mxu1 }
 0x15f   : > { %v483_v36 = vadd.f32 %v3404_v25, %v482_v32  ;;  %v547_v37 = vadd.f32 %v3404_v25, %v546_v33  ;;  %v2885_v38 = vpop.f32.mrb[2].mxu0  ;;  %v2901_v39 = vpop.f32.mrb[2].mxu1 }
 0x160   : > { %v611_v40 = vmax.f32 %v491_v29, 0.0  ;;  %v627_v43 = vmax.f32 %v555_v31, 0.0  ;;  %v3420_v44 = vpop.f32.mrb[3].mxu0  ;;  %v3422_v45 = vpop.f32.mrb[3].mxu1  ;;  %v3429_v48 = vadd.f32 %v2885_v38, %v3404_v25  ;;  %v3432_v49 = vadd.f32 %v2901_v39, %v3404_v25 }
 0x161   : > { %v3426_v47 = vmax.f32 %v483_v36, 0.0  ;;  %v3436_v53 = vmax.f32 %v547_v37, 0.0 }
 0x162   : > { %v675_v50 = vcombine.high %v611_v40, %v611_v40  ;;  %v809_v51 = vmul.f32 %v3410_v34, %v611_v40  ;;  %v1195_v52 = vmul.f32 %v3412_v35, %v611_v40  ;;  %v743_v54 = vmul.f32 %v3407_v30, %v611_v40 }
 0x163   : > { %v1581_v55 = vmul.f32 %v3416_v41, %v611_v40  ;;  %v691_v56 = vcombine.high %v627_v43, %v627_v43  ;;  %v841_v57 = vmul.f32 %v3410_v34, %v627_v43  ;;  %v775_v61 = vmul.f32 %v3407_v30, %v627_v43 }
 0x164   : > { %v810_v58 = vmul.f32 %v3410_v34, %v675_v50  ;;  %v2643_v59 = vrot.slane %v809_v51, 9  ;;  %v1196_v60 = vmul.f32 %v3412_v35, %v675_v50  ;;  %v744_v62 = vmul.f32 %v3407_v30, %v675_v50 }
 0x165   : > { %v2708_v63 = vrot.slane %v1195_v52, 10  ;;  %v1582_v0 = vmul.f32 %v3416_v41, %v675_v50  ;;  %v2773_v1 = vrot.slane %v1581_v55, 11  ;;  %v3446_v2 = vpop.f32.mrb[4].mxu0  ;;  %v3448_v3 = vpop.f32.mrb[4].mxu1  ;;  %v776_v6 = vmul.f32 %v3407_v30, %v691_v56 }
 0x166   : > { %v2644_v4 = vrot.slane %v810_v58, 9  ;;  %v1129_v5 = vadd.f32 %v2643_v59, %v743_v54  ;;  %v842_v7 = vmul.f32 %v3410_v34, %v691_v56  ;;  %v3452_v8 = vpop.f32.mrb[5].mxu0  ;;  %v3454_v9 = vpop.f32.mrb[5].mxu1  ;;  %v2709_v10 = vrot.slane %v1196_v60, 10 }
 0x167   : > { %v2675_v11 = vrot.slane %v841_v57, 9  ;;  %v1227_v12 = vmul.f32 %v3412_v35, %v627_v43  ;;  %v1228_v13 = vmul.f32 %v3412_v35, %v691_v56  ;;  %v3458_v14 = vpop.f32.mrb[6].mxu0  ;;  %v3460_v15 = vpop.f32.mrb[6].mxu1  ;;  %v1613_v19 = vmul.f32 %v3416_v41, %v627_v43 }
 0x168   : > { %v1130_v16 = vadd.f32 %v2644_v4, %v744_v62  ;;  %v1515_v17 = vadd.f32 %v2708_v63, %v1129_v5  ;;  %v2676_v18 = vrot.slane %v842_v7, 9  ;;  %v3463_v20 = vpop.f32.mrb[7].mxu0  ;;  %v3465_v21 = vpop.f32.mrb[7].mxu1  ;;  %v2774_v22 = vrot.slane %v1582_v0, 11 }
 0x169   : > { %v1161_v23 = vadd.f32 %v2675_v11, %v775_v61  ;;  %v2740_v24 = vrot.slane %v1227_v12, 10  ;;  %v1614_v26 = vmul.f32 %v3416_v41, %v691_v56  ;;  %v2741_v31 = vrot.slane %v1228_v13, 10 }
 0x16a   : > { %v1516_v27 = vadd.f32 %v2709_v10, %v1130_v16  ;;  %v1901_v28 = vadd.f32 %v2773_v1, %v1515_v17  ;;  %v1162_v29 = vadd.f32 %v2676_v18, %v776_v6  ;;  %v2805_v33 = vrot.slane %v1613_v19, 11 }
 0x16b   : > { %v1547_v32 = vadd.f32 %v2740_v24, %v1161_v23  ;;  %v2806_v36 = vrot.slane %v1614_v26, 11  ;;  %v673_v37 = vcombine.high %v3426_v47, %v3426_v47  ;;  %v805_v43 = vmul.f32 %v3410_v34, %v3426_v47 }
 0x16c   : > { %v1902_v38 = vadd.f32 %v2774_v22, %v1516_v27  ;;  %v1967_v39 = vadd.f32 %v3418_v42, %v1901_v28  ;;  %v1548_v40 = vadd.f32 %v2741_v31, %v1162_v29  ;;  %v739_v51 = vmul.f32 %v3407_v30, %v3426_v47 }
 0x16d   : > { %v1933_v50 = vadd.f32 %v2805_v33, %v1547_v32  ;;  %v806_v52 = vmul.f32 %v3410_v34, %v673_v37  ;;  %v1191_v54 = vmul.f32 %v3412_v35, %v3426_v47  ;;  %v3478_v55 = vpop.f32.mrb[8].mxu0  ;;  %v3480_v56 = vpop.f32.mrb[8].mxu1  ;;  %v2639_v60 = vrot.slane %v805_v43, 9 }
 0x16e   : > { %v1968_v57 = vadd.f32 %v3418_v42, %v1902_v38  ;;  %v2031_v58 = vmax.f32 %v1967_v39, 0.0  ;;  %v1934_v59 = vadd.f32 %v2806_v36, %v1548_v40  ;;  %v3483_v61 = vpop.f32.mrb[9].mxu0  ;;  %v3485_v62 = vpop.f32.mrb[9].mxu1  ;;  %v740_v0 = vmul.f32 %v3407_v30, %v673_v37 }
 0x16f   : > { %v1999_v63 = vadd.f32 %v3418_v42, %v1933_v50  ;;  %v2640_v1 = vrot.slane %v806_v52, 9  ;;  %v1192_v4 = vmul.f32 %v3412_v35, %v673_v37  ;;  %v3490_v5 = vpop.f32.mrb[10].mxu0  ;;  %v1125_v10 = vadd.f32 %v2639_v60, %v739_v51  ;;  %v3512_v32 = vpop.f32.mrb[10].mxu1 }
 0x170   : > { %v2032_v6 = vmax.f32 %v1968_v57, 0.0  ;;  %v2000_v7 = vadd.f32 %v3418_v42, %v1934_v59  ;;  %v2704_v11 = vrot.slane %v1191_v54, 10  ;;  %v1577_v16 = vmul.f32 %v3416_v41, %v3426_v47 }
 0x171   : > { %v1126_v12 = vadd.f32 %v2640_v1, %v740_v0  ;;  %v2705_v13 = vrot.slane %v1192_v4, 10  ;;  %v486_v17 = vadd.f32 %v3404_v25, %v3420_v44  ;;  %v3498_v18 = vrot.slane %v2031_v58, %v3424_v46 }
 0x172   : > { %v1511_v19 = vadd.f32 %v2704_v11, %v1125_v10  ;;  %v1578_v22 = vmul.f32 %v3416_v41, %v673_v37  ;;  %v3503_v23 = vadd.f32 %v3404_v25, %v3422_v45  ;;  %v2063_v24 = vmax.f32 %v1999_v63, 0.0 }
 0x173   : > { %v1512_v26 = vadd.f32 %v2705_v13, %v1126_v12  ;;  %v2769_v27 = vrot.slane %v1577_v16, 11  ;;  %v689_v28 = vcombine.high %v3436_v53, %v3436_v53  ;;  %v3508_v47 = vrot.slane %v2032_v6, %v3424_v46 }
 0x174   : > { %v2064_v44 = vmax.f32 %v2000_v7, 0.0  ;;  %v2770_v29 = vrot.slane %v1578_v22, 11  ;;  %v837_v31 = vmul.f32 %v3410_v34, %v3436_v53  ;;  %v771_v45 = vmul.f32 %v3407_v30, %v3436_v53 }
 0x175   : > { %v1897_v33 = vadd.f32 %v2769_v27, %v1511_v19  ;;  %v838_v36 = vmul.f32 %v3410_v34, %v689_v28  ;;  %v1223_v37 = vmul.f32 %v3412_v35, %v3436_v53  ;;  %v1224_v40 = vmul.f32 %v3412_v35, %v689_v28  ;;  %v3538_v27 = vpop.f32.mrb[11].mxu0 }
 0x176   : > { %v1898_v38 = vadd.f32 %v2770_v29, %v1512_v26  ;;  %v2671_v39 = vrot.slane %v837_v31, 9  ;;  %v1609_v43 = vmul.f32 %v3416_v41, %v3436_v53  ;;  %v772_v51 = vmul.f32 %v3407_v30, %v689_v28 }
 0x177   : > { %v1963_v50 = vadd.f32 %v3418_v42, %v1897_v33  ;;  %v2672_v52 = vrot.slane %v838_v36, 9  ;;  %v1610_v54 = vmul.f32 %v3416_v41, %v689_v28  ;;  %v3526_v57 = vrot.slane %v2063_v24, %v3424_v46 }
 0x178   : > { %v1964_v58 = vadd.f32 %v3418_v42, %v1898_v38  ;;  %v1157_v59 = vadd.f32 %v2671_v39, %v771_v45  ;;  %v2736_v60 = vrot.slane %v1223_v37, 10  ;;  %v2737_v1 = vrot.slane %v1224_v40, 10 }
 0x179   : > { %v2027_v63 = vmax.f32 %v1963_v50, 0.0  ;;  %v1158_v0 = vadd.f32 %v2672_v52, %v772_v51  ;;  %v612_v4 = vmax.f32 %v3429_v48, 0.0  ;;  %v3531_v53 = vrot.slane %v2064_v44, %v3424_v46 }
 0x17a   : > { %v2028_v6 = vmax.f32 %v1964_v58, 0.0  ;;  %v1543_v7 = vadd.f32 %v2736_v60, %v1157_v59  ;;  %v2801_v10 = vrot.slane %v1609_v43, 11  ;;  %v2802_v12 = vrot.slane %v1610_v54, 11 }
 0x17b   : > { %v1544_v11 = vadd.f32 %v2737_v1, %v1158_v0  ;;  %v676_v13 = vcombine.high %v612_v4, %v612_v4  ;;  %v628_v16 = vmax.f32 %v3432_v49, 0.0  ;;  %v811_v22 = vmul.f32 %v3410_v34, %v612_v4  ;;  %v3551_v1 = vpop.f32.mrb[11].mxu1 }
 0x17c   : > { %v1929_v19 = vadd.f32 %v2801_v10, %v1543_v7  ;;  %v1197_v24 = vmul.f32 %v3412_v35, %v612_v4  ;;  %v3536_v26 = vmax.f32 %v486_v17, 0.0  ;;  %v2158_v48 = vrot.slane %v2027_v63, %v3424_v46 }
 0x17d   : > { %v1930_v28 = vadd.f32 %v2802_v12, %v1544_v11  ;;  %v812_v44 = vmul.f32 %v3410_v34, %v676_v13  ;;  %v1198_v29 = vmul.f32 %v3412_v35, %v676_v13  ;;  %v2162_v31 = vrot.slane %v2028_v6, %v3424_v46 }
 0x17e   : > { %v1995_v49 = vadd.f32 %v3418_v42, %v1929_v19  ;;  %v745_v33 = vmul.f32 %v3407_v30, %v612_v4  ;;  %v2645_v45 = vrot.slane %v811_v22, 9  ;;  %v746_v36 = vmul.f32 %v3407_v30, %v676_v13 }
 0x17f   : > { %v1996_v17 = vadd.f32 %v3418_v42, %v1930_v28  ;;  %v2646_v37 = vrot.slane %v812_v44, 9  ;;  %v1583_v38 = vmul.f32 %v3416_v41, %v612_v4  ;;  %v2710_v40 = vrot.slane %v1197_v24, 10 }
 0x180   : > { %v1131_v39 = vadd.f32 %v2645_v45, %v745_v33  ;;  %v1584_v43 = vmul.f32 %v3416_v41, %v676_v13  ;;  %v692_v50 = vcombine.high %v628_v16, %v628_v16  ;;  %v2059_v51 = vmax.f32 %v1995_v49, 0.0 }
 0x181   : > { %v2060_v52 = vmax.f32 %v1996_v17, 0.0  ;;  %v1132_v54 = vadd.f32 %v2646_v37, %v746_v36  ;;  %v2711_v58 = vrot.slane %v1198_v29, 10  ;;  %v2775_v60 = vrot.slane %v1583_v38, 11 }
 0x182   : > { %v1517_v59 = vadd.f32 %v2710_v40, %v1131_v39  ;;  %v2776_v63 = vrot.slane %v1584_v43, 11  ;;  %v777_v0 = vmul.f32 %v3407_v30, %v628_v16  ;;  %v843_v4 = vmul.f32 %v3410_v34, %v628_v16 }
 0x183   : > { %v2290_v6 = vrot.slane %v2060_v52, %v3424_v46  ;;  %v1518_v7 = vadd.f32 %v2711_v58, %v1132_v54  ;;  %v844_v10 = vmul.f32 %v3410_v34, %v692_v50  ;;  %v1229_v12 = vmul.f32 %v3412_v35, %v628_v16 }
 0x184   : > { %v1903_v11 = vadd.f32 %v2775_v60, %v1517_v59  ;;  %v1230_v13 = vmul.f32 %v3412_v35, %v692_v50  ;;  %v1615_v19 = vmul.f32 %v3416_v41, %v628_v16  ;;  %v778_v24 = vmul.f32 %v3407_v30, %v692_v50 }
 0x185   : > { %v1904_v22 = vadd.f32 %v2776_v63, %v1518_v7  ;;  %v2677_v28 = vrot.slane %v843_v4, 9  ;;  %v2678_v44 = vrot.slane %v844_v10, 9  ;;  %v2286_v29 = vrot.slane %v2059_v51, %v3424_v46 }
 0x186   : > { %v1969_v49 = vadd.f32 %v3418_v42, %v1903_v11  ;;  %v2742_v33 = vrot.slane %v1229_v12, 10  ;;  %v1616_v45 = vmul.f32 %v3416_v41, %v692_v50  ;;  %v2743_v38 = vrot.slane %v1230_v13, 10 }
 0x187   : > { %v1970_v17 = vadd.f32 %v3418_v42, %v1904_v22  ;;  %v1163_v36 = vadd.f32 %v2677_v28, %v777_v0  ;;  %v1164_v37 = vadd.f32 %v2678_v44, %v778_v24  ;;  %v3565_v39 = vsel %vm2411_vm0, %v2162_v31, %v2158_v48 }
 0x188   : > { %v3568_v16 = vsel %vm2411_vm0, %v2290_v6, %v2286_v29  ;;  %v2807_v40 = vrot.slane %v1615_v19, 11  ;;  %v674_v43 = vcombine.high %v3536_v26, %v3536_v26  ;;  %v2808_v54 = vrot.slane %v1616_v45, 11 }
 0x189   : > { %v1549_v51 = vadd.f32 %v2742_v33, %v1163_v36  ;;  %v1550_v52 = vadd.f32 %v2743_v38, %v1164_v37  ;;  %v807_v50 = vmul.f32 %v3410_v34, %v3536_v26  ;;  %v2033_v58 = vmax.f32 %v1969_v49, 0.0  ;;  %v3589_v49 = vpop.f32.mrb[12].mxu0 }
 0x18a   : > { %v741_v59 = vmul.f32 %v3407_v30, %v3536_v26  ;;  %v808_v48 = vmul.f32 %v3410_v34, %v674_v43  ;;  %v1193_v31 = vmul.f32 %v3412_v35, %v3536_v26  ;;  %v2034_v60 = vmax.f32 %v1970_v17, 0.0 }
 0x18b   : > { %v1935_v63 = vadd.f32 %v2807_v40, %v1549_v51  ;;  %v1936_v0 = vadd.f32 %v2808_v54, %v1550_v52  ;;  %v2641_v6 = vrot.slane %v807_v50, 9  ;;  %v742_v7 = vmul.f32 %v3407_v30, %v674_v43 }
 0x18c   : > { %v2642_v4 = vrot.slane %v808_v48, 9  ;;  %v1194_v10 = vmul.f32 %v3412_v35, %v674_v43  ;;  %v1579_v11 = vmul.f32 %v3416_v41, %v3536_v26  ;;  %v2706_v19 = vrot.slane %v1193_v31, 10 }
 0x18d   : > { %v2001_v12 = vadd.f32 %v3418_v42, %v1935_v63  ;;  %v1127_v13 = vadd.f32 %v2641_v6, %v741_v59  ;;  %v1580_v22 = vmul.f32 %v3416_v41, %v674_v43  ;;  %v3586_v24 = vrot.slane %v2033_v58, %v3424_v46 }
 0x18e   : > { %v1128_v28 = vadd.f32 %v2642_v4, %v742_v7  ;;  %v2707_v44 = vrot.slane %v1194_v10, 10  ;;  %v626_v29 = vmax.f32 %v3503_v23, 0.0  ;;  %v3592_v33 = vrot.slane %v2034_v60, %v3424_v46 }
 0x18f   : > { %v3595_v26 = vadd.f32 %v3418_v42, %v1936_v0  ;;  %v1513_v45 = vadd.f32 %v2706_v19, %v1127_v13  ;;  %v2771_v17 = vrot.slane %v1579_v11, 11  ;;  %v2772_v37 = vrot.slane %v1580_v22, 11  ;;  %v3605_v0 = vpop.f32.mrb[12].mxu1 }
 0x190   : > { %v1514_v36 = vadd.f32 %v2707_v44, %v1128_v28  ;;  %v690_v38 = vcombine.high %v626_v29, %v626_v29  ;;  %v839_v40 = vmul.f32 %v3410_v34, %v626_v29  ;;  %v2065_v43 = vmax.f32 %v2001_v12, 0.0 }
 0x191   : > { %v1899_v51 = vadd.f32 %v2771_v17, %v1513_v45  ;;  %v773_v23 = vmul.f32 %v3407_v30, %v626_v29  ;;  %v1225_v52 = vmul.f32 %v3412_v35, %v626_v29  ;;  %v1611_v63 = vmul.f32 %v3416_v41, %v626_v29 }
 0x192   : > { %v1900_v54 = vadd.f32 %v2772_v37, %v1514_v36  ;;  %v774_v50 = vmul.f32 %v3407_v30, %v690_v38  ;;  %v840_v58 = vmul.f32 %v3410_v34, %v690_v38  ;;  %v2673_v59 = vrot.slane %v839_v40, 9 }
 0x193   : > { %v1965_v48 = vadd.f32 %v3418_v42, %v1899_v51  ;;  %v1226_v31 = vmul.f32 %v3412_v35, %v690_v38  ;;  %v2738_v60 = vrot.slane %v1225_v52, 10  ;;  %v1612_v10 = vmul.f32 %v3416_v41, %v690_v38 }
 0x194   : > { %v1966_v6 = vadd.f32 %v3418_v42, %v1900_v54  ;;  %v2674_v7 = vrot.slane %v840_v58, 9  ;;  %v1159_v4 = vadd.f32 %v2673_v59, %v773_v23  ;;  %v2066_v11 = vmax.f32 %v3595_v26, 0.0 }
 0x195   : > { %v2029_v12 = vmax.f32 %v1965_v48, 0.0  ;;  %v2739_v13 = vrot.slane %v1226_v31, 10  ;;  %v507_v19 = vadd.f32 %v3446_v2, %v3404_v25  ;;  %v2803_v29 = vrot.slane %v1611_v63, 11 }
 0x196   : > { %v2030_v22 = vmax.f32 %v1966_v6, 0.0  ;;  %v1160_v28 = vadd.f32 %v2674_v7, %v774_v50  ;;  %v1545_v44 = vadd.f32 %v2738_v60, %v1159_v4  ;;  %v2310_v45 = vrot.slane %v2065_v43, %v3424_v46 }
 0x197   : > { %v2166_v17 = vrot.slane %v2029_v12, %v3424_v46  ;;  %v2804_v36 = vrot.slane %v1612_v10, 11  ;;  %v615_v37 = vmax.f32 %v507_v19, 0.0  ;;  %v571_v51 = vadd.f32 %v3448_v3, %v3404_v25 }
 0x198   : > { %v2170_v38 = vrot.slane %v2030_v22, %v3424_v46  ;;  %v1546_v40 = vadd.f32 %v2739_v13, %v1160_v28  ;;  %v1931_v26 = vadd.f32 %v2803_v29, %v1545_v44  ;;  %v499_v43 = vadd.f32 %v3404_v25, %v3452_v8 }
 0x199   : > { %v2414_v2 = vsel %vm2413_vm1, %v2166_v17, %v3565_v39  ;;  %v679_v23 = vcombine.high %v615_v37, %v615_v37  ;;  %v817_v52 = vmul.f32 %v3410_v34, %v615_v37  ;;  %v1203_v59 = vmul.f32 %v3412_v35, %v615_v37 }
 0x19a   : > { %v2416_v54 = vsel %vm2415_vm2, %v2170_v38, %v2414_v2  ;;  %v1932_v50 = vadd.f32 %v2804_v36, %v1546_v40  ;;  %v1997_v58 = vadd.f32 %v3418_v42, %v1931_v26  ;;  %v751_v48 = vmul.f32 %v3407_v30, %v615_v37 }
 0x19b   : > { %v2418_v3 = vsel %vm2417_vm3, %v3498_v18, %v2416_v54  ;;  %v818_v39 = vmul.f32 %v3410_v34, %v679_v23  ;;  %v2651_v31 = vrot.slane %v817_v52, 9  ;;  %v1204_v6 = vmul.f32 %v3412_v35, %v679_v23 }
 0x19c   : > { %v2420_v60 = vsel %vm2419_vm4, %v3508_v47, %v2418_v3  ;;  %v1998_v8 = vadd.f32 %v3418_v42, %v1932_v50  ;;  %v2061_v63 = vmax.f32 %v1997_v58, 0.0  ;;  %v752_v4 = vmul.f32 %v3407_v30, %v679_v23  ;;  %v3640_v47 = vpop.f32.mrb[13].mxu0  ;;  %v3655_v58 = vpop.f32.mrb[13].mxu1 }
 0x19d   : > { %v2422_v7 = vsel %vm2421_vm5, %v3586_v24, %v2420_v60  ;;  %v2652_v10 = vrot.slane %v818_v39, 9  ;;  %v1137_v18 = vadd.f32 %v2651_v31, %v751_v48  ;;  %v2716_v22 = vrot.slane %v1203_v59, 10 }
 0x19e   : > { %v2424_v12 = vsel %vm2423_vm6, %v3592_v33, %v2422_v7  ;;  %v2062_v13 = vmax.f32 %v1998_v8, 0.0  ;;  %v2294_v19 = vrot.slane %v2061_v63, %v3424_v46  ;;  %v2717_v44 = vrot.slane %v1204_v6, 10 }
 0x19f   : > { %2482 = vst [vmem:[%s3642_s8] sm:$0xff] %v2424_v12  ;;  %v1138_v28 = vadd.f32 %v2652_v10, %v752_v4  ;;  %v1589_v24 = vmul.f32 %v3416_v41, %v615_v37  ;;  %v1590_v29 = vmul.f32 %v3416_v41, %v679_v23  ;;  %v1523_v36 = vadd.f32 %v2716_v22, %v1137_v18 }
 0x1a0   : > { %v2298_v17 = vrot.slane %v2062_v13, %v3424_v46  ;;  %v2447_v33 = vsel %vm2413_vm1, %v2294_v19, %v3568_v16  ;;  %v631_v38 = vmax.f32 %v571_v51, 0.0  ;;  %v2314_v40 = vrot.slane %v2066_v11, %v3424_v46 }
 0x1a1   : > { %v1524_v26 = vadd.f32 %v2717_v44, %v1138_v28  ;;  %v613_v2 = vmax.f32 %v499_v43, 0.0  ;;  %v563_v52 = vadd.f32 %v3404_v25, %v3454_v9  ;;  %v2781_v50 = vrot.slane %v1589_v24, 11  ;;  %v3674_v24 = vpop.f32.mrb[14].mxu0 }
 0x1a2   : > { %v2448_v54 = vsel %vm2415_vm2, %v2298_v17, %v2447_v33  ;;  %v695_v37 = vcombine.high %v631_v38, %v631_v38  ;;  %v849_v23 = vmul.f32 %v3410_v34, %v631_v38  ;;  %v2782_v51 = vrot.slane %v1590_v29, 11 }
 0x1a3   : > { %v2449_v16 = vsel %vm2417_vm3, %v3526_v57, %v2448_v54  ;;  %v783_v11 = vmul.f32 %v3407_v30, %v631_v38  ;;  %v1235_v43 = vmul.f32 %v3412_v35, %v631_v38  ;;  %v1909_v59 = vadd.f32 %v2781_v50, %v1523_v36 }
 0x1a4   : > { %v2450_v9 = vsel %vm2419_vm4, %v3531_v53, %v2449_v16  ;;  %v850_v3 = vmul.f32 %v3410_v34, %v695_v37  ;;  %v2683_v48 = vrot.slane %v849_v23, 9  ;;  %v1910_v31 = vadd.f32 %v2782_v51, %v1524_v26 }
 0x1a5   : > { %v2451_v39 = vsel %vm2421_vm5, %v2310_v45, %v2450_v9  ;;  %v784_v60 = vmul.f32 %v3407_v30, %v695_v37  ;;  %v1236_v57 = vmul.f32 %v3412_v35, %v695_v37  ;;  %v2748_v7 = vrot.slane %v1235_v43, 10 }
 0x1a6   : > { %v2452_v8 = vsel %vm2423_vm6, %v2314_v40, %v2451_v39  ;;  %v2684_v63 = vrot.slane %v850_v3, 9  ;;  %v1169_v6 = vadd.f32 %v2683_v48, %v783_v11  ;;  %v1621_v4 = vmul.f32 %v3416_v41, %v631_v38 }
 0x1a7   : > { %2486 = vst [vmem:[%s3642_s8 + $0x20] sm:$0xff] %v2452_v8  ;;  %v1622_v18 = vmul.f32 %v3416_v41, %v695_v37  ;;  %v677_v12 = vcombine.high %v613_v2, %v613_v2  ;;  %v2749_v13 = vrot.slane %v1236_v57, 10  ;;  %v629_v45 = vmax.f32 %v563_v52, 0.0 }
 0x1a8   : > { %v1170_v53 = vadd.f32 %v2684_v63, %v784_v60  ;;  %v1555_v10 = vadd.f32 %v2748_v7, %v1169_v6  ;;  %v1975_v19 = vadd.f32 %v3418_v42, %v1909_v59  ;;  %v1976_v22 = vadd.f32 %v3418_v42, %v1910_v31  ;;  %v3689_v7 = vpop.f32.mrb[14].mxu1 }
 0x1a9   : > { %v2813_v28 = vrot.slane %v1621_v4, 11  ;;  %v813_v44 = vmul.f32 %v3410_v34, %v613_v2  ;;  %v814_v17 = vmul.f32 %v3410_v34, %v677_v12  ;;  %v1199_v33 = vmul.f32 %v3412_v35, %v613_v2 }
 0x1aa   : > { %v1556_v29 = vadd.f32 %v2749_v13, %v1170_v53  ;;  %v1200_v36 = vmul.f32 %v3412_v35, %v677_v12  ;;  %v2814_v38 = vrot.slane %v1622_v18, 11  ;;  %v747_v26 = vmul.f32 %v3407_v30, %v613_v2 }
 0x1ab   : > { %v1941_v40 = vadd.f32 %v2813_v28, %v1555_v10  ;;  %v2647_v52 = vrot.slane %v813_v44, 9  ;;  %v748_v54 = vmul.f32 %v3407_v30, %v677_v12  ;;  %v2648_v50 = vrot.slane %v814_v17, 9 }
 0x1ac   : > { %v1585_v37 = vmul.f32 %v3416_v41, %v613_v2  ;;  %v1586_v23 = vmul.f32 %v3416_v41, %v677_v12  ;;  %v2039_v16 = vmax.f32 %v1975_v19, 0.0  ;;  %v2040_v51 = vmax.f32 %v1976_v22, 0.0 }
 0x1ad   : > { %v1133_v11 = vadd.f32 %v2647_v52, %v747_v26  ;;  %v2712_v43 = vrot.slane %v1199_v33, 10  ;;  %v1942_v9 = vadd.f32 %v2814_v38, %v1556_v29  ;;  %v1134_v59 = vadd.f32 %v2648_v50, %v748_v54 }
 0x1ae   : > { %v2713_v3 = vrot.slane %v1200_v36, 10  ;;  %v693_v48 = vcombine.high %v629_v45, %v629_v45  ;;  %v3684_v39 = vadd.f32 %v3418_v42, %v1941_v40  ;;  %v845_v60 = vmul.f32 %v3410_v34, %v629_v45 }
 0x1af   : > { %v1519_v31 = vadd.f32 %v2712_v43, %v1133_v11  ;;  %v1231_v57 = vmul.f32 %v3412_v35, %v629_v45  ;;  %v2777_v2 = vrot.slane %v1585_v37, 11  ;;  %v2778_v63 = vrot.slane %v1586_v23, 11 }
 0x1b0   : > { %v1520_v8 = vadd.f32 %v2713_v3, %v1134_v59  ;;  %v846_v6 = vmul.f32 %v3410_v34, %v693_v48  ;;  %v779_v4 = vmul.f32 %v3407_v30, %v629_v45  ;;  %v780_v53 = vmul.f32 %v3407_v30, %v693_v48 }
 0x1b1   : > { %v2679_v10 = vrot.slane %v845_v60, 9  ;;  %v1232_v18 = vmul.f32 %v3412_v35, %v693_v48  ;;  %v1905_v12 = vadd.f32 %v2777_v2, %v1519_v31  ;;  %v1617_v22 = vmul.f32 %v3416_v41, %v629_v45 }
 0x1b2   : > { %v1906_v13 = vadd.f32 %v2778_v63, %v1520_v8  ;;  %v2680_v19 = vrot.slane %v846_v6, 9  ;;  %v3696_v28 = vadd.f32 %v3418_v42, %v1942_v9  ;;  %v2744_v29 = vrot.slane %v1231_v57, 10  ;;  %v3719_v63 = vpop.f32.mrb[15].mxu0 }
 0x1b3   : > { %v1165_v44 = vadd.f32 %v2679_v10, %v779_v4  ;;  %v1618_v17 = vmul.f32 %v3416_v41, %v693_v48  ;;  %v2745_v38 = vrot.slane %v1232_v18, 10  ;;  %v510_v40 = vadd.f32 %v3458_v14, %v3404_v25 }
 0x1b4   : > { %v1972_v33 = vadd.f32 %v3418_v42, %v1906_v13  ;;  %v1166_v36 = vadd.f32 %v2680_v19, %v780_v53  ;;  %v2809_v52 = vrot.slane %v1617_v22, 11  ;;  %v574_v54 = vadd.f32 %v3460_v15, %v3404_v25 }
 0x1b5   : > { %v1551_v26 = vadd.f32 %v2744_v29, %v1165_v44  ;;  %v1971_v45 = vadd.f32 %v3418_v42, %v1905_v12  ;;  %v2810_v37 = vrot.slane %v1618_v17, 11  ;;  %v616_v23 = vmax.f32 %v510_v40, 0.0 }
 0x1b6   : > { %v1552_v50 = vadd.f32 %v2745_v38, %v1166_v36  ;;  %v3706_v11 = vrot.slane %v2039_v16, %v3424_v46  ;;  %v3709_v43 = vrot.slane %v2040_v51, %v3424_v46  ;;  %v2071_v9 = vmax.f32 %v3684_v39, 0.0 }
 0x1b7   : > { %v1937_v59 = vadd.f32 %v2809_v52, %v1551_v26  ;;  %v2072_v14 = vmax.f32 %v3696_v28, 0.0  ;;  %v2036_v3 = vmax.f32 %v1972_v33, 0.0  ;;  %v680_v31 = vcombine.high %v616_v23, %v616_v23  ;;  %v3728_v26 = vpop.f32.mrb[15].mxu1 }
 0x1b8   : > { %v1938_v48 = vadd.f32 %v2810_v37, %v1552_v50  ;;  %v819_v60 = vmul.f32 %v3410_v34, %v616_v23  ;;  %v1205_v57 = vmul.f32 %v3412_v35, %v616_v23  ;;  %v632_v8 = vmax.f32 %v574_v54, 0.0 }
 0x1b9   : > { %v2003_v15 = vadd.f32 %v3418_v42, %v1937_v59  ;;  %v2035_v16 = vmax.f32 %v1971_v45, 0.0  ;;  %v820_v51 = vmul.f32 %v3410_v34, %v680_v31  ;;  %v1591_v39 = vmul.f32 %v3416_v41, %v616_v23 }
 0x1ba   : > { %v2004_v2 = vadd.f32 %v3418_v42, %v1938_v48  ;;  %v753_v6 = vmul.f32 %v3407_v30, %v616_v23  ;;  %v2653_v4 = vrot.slane %v819_v60, 9  ;;  %v1206_v53 = vmul.f32 %v3412_v35, %v680_v31 }
 0x1bb   : > { %v502_v10 = vadd.f32 %v3404_v25, %v3463_v20  ;;  %v2194_v18 = vrot.slane %v2036_v3, %v3424_v46  ;;  %v754_v12 = vmul.f32 %v3407_v30, %v680_v31  ;;  %v2654_v13 = vrot.slane %v820_v51, 9 }
 0x1bc   : > { %v1592_v19 = vmul.f32 %v3416_v41, %v680_v31  ;;  %v2067_v22 = vmax.f32 %v2003_v15, 0.0  ;;  %v1139_v44 = vadd.f32 %v2653_v4, %v753_v6  ;;  %v2718_v29 = vrot.slane %v1205_v57, 10 }
 0x1bd   : > { %v696_v17 = vcombine.high %v632_v8, %v632_v8  ;;  %v2068_v33 = vmax.f32 %v2004_v2, 0.0  ;;  %v1140_v36 = vadd.f32 %v2654_v13, %v754_v12  ;;  %v2719_v38 = vrot.slane %v1206_v53, 10 }
 0x1be   : > { %v2783_v40 = vrot.slane %v1591_v39, 11  ;;  %v1525_v52 = vadd.f32 %v2718_v29, %v1139_v44  ;;  %v2784_v54 = vrot.slane %v1592_v19, 11  ;;  %v851_v20 = vmul.f32 %v3410_v34, %v632_v8 }
 0x1bf   : > { %v852_v45 = vmul.f32 %v3410_v34, %v696_v17  ;;  %v1526_v50 = vadd.f32 %v2719_v38, %v1140_v36  ;;  %v785_v37 = vmul.f32 %v3407_v30, %v632_v8  ;;  %v1237_v23 = vmul.f32 %v3412_v35, %v632_v8 }
 0x1c0   : > { %v1238_v59 = vmul.f32 %v3412_v35, %v696_v17  ;;  %v1911_v3 = vadd.f32 %v2783_v40, %v1525_v52  ;;  %v2685_v48 = vrot.slane %v851_v20, 9  ;;  %v1623_v15 = vmul.f32 %v3416_v41, %v632_v8 }
 0x1c1   : > { %v2686_v31 = vrot.slane %v852_v45, 9  ;;  %v2190_v60 = vrot.slane %v2035_v16, %v3424_v46  ;;  %v1912_v57 = vadd.f32 %v2784_v54, %v1526_v50  ;;  %v786_v2 = vmul.f32 %v3407_v30, %v696_v17 }
 0x1c2   : > { %v1624_v51 = vmul.f32 %v3416_v41, %v696_v17  ;;  %v3740_v39 = vrot.slane %v2071_v9, %v3424_v46  ;;  %v1977_v6 = vadd.f32 %v3418_v42, %v1911_v3  ;;  %v1171_v4 = vadd.f32 %v2685_v48, %v785_v37 }
 0x1c3   : > { %v566_v53 = vadd.f32 %v3404_v25, %v3465_v21  ;;  %v3746_v12 = vsel %vm2411_vm0, %v2194_v18, %v2190_v60  ;;  %v3749_v8 = vrot.slane %v2067_v22, %v3424_v46  ;;  %v1172_v16 = vadd.f32 %v2686_v31, %v786_v2 }
 0x1c4   : > { %v614_v13 = vmax.f32 %v502_v10, 0.0  ;;  %v3752_v19 = vrot.slane %v2068_v33, %v3424_v46  ;;  %v2750_v44 = vrot.slane %v1237_v23, 10  ;;  %v2751_v9 = vrot.slane %v1238_v59, 10 }
 0x1c5   : > { %v2815_v29 = vrot.slane %v1623_v15, 11  ;;  %v1978_v17 = vadd.f32 %v3418_v42, %v1912_v57  ;;  %v2816_v36 = vrot.slane %v1624_v51, 11  ;;  %v2041_v40 = vmax.f32 %v1977_v6, 0.0 }
 0x1c6   : > { %v678_v38 = vcombine.high %v614_v13, %v614_v13  ;;  %v815_v21 = vmul.f32 %v3410_v34, %v614_v13  ;;  %v1557_v18 = vadd.f32 %v2750_v44, %v1171_v4  ;;  %v1201_v52 = vmul.f32 %v3412_v35, %v614_v13 }
 0x1c7   : > { %v630_v22 = vmax.f32 %v566_v53, 0.0  ;;  %v1558_v54 = vadd.f32 %v2751_v9, %v1172_v16  ;;  %v749_v10 = vmul.f32 %v3407_v30, %v614_v13  ;;  %v523_v23 = vadd.f32 %v3478_v55, %v3404_v25 }
 0x1c8   : > { %v816_v33 = vmul.f32 %v3410_v34, %v678_v38  ;;  %v2649_v20 = vrot.slane %v815_v21, 9  ;;  %v750_v45 = vmul.f32 %v3407_v30, %v678_v38  ;;  %v1202_v50 = vmul.f32 %v3412_v35, %v678_v38 }
 0x1c9   : > { %v2714_v37 = vrot.slane %v1201_v52, 10  ;;  %v1587_v48 = vmul.f32 %v3416_v41, %v614_v13  ;;  %v1588_v31 = vmul.f32 %v3416_v41, %v678_v38  ;;  %v2042_v15 = vmax.f32 %v1978_v17, 0.0 }
 0x1ca   : > { %v2650_v59 = vrot.slane %v816_v33, 9  ;;  %v1135_v3 = vadd.f32 %v2649_v20, %v749_v10  ;;  %v3766_v60 = vrot.slane %v2041_v40, %v3424_v46  ;;  %v1943_v57 = vadd.f32 %v2815_v29, %v1557_v18 }
 0x1cb   : > { %v694_v2 = vcombine.high %v630_v22, %v630_v22  ;;  %v2715_v6 = vrot.slane %v1202_v50, 10  ;;  %v2779_v53 = vrot.slane %v1587_v48, 11  ;;  %v1944_v16 = vadd.f32 %v2816_v36, %v1558_v54 }
 0x1cc   : > { %v1136_v51 = vadd.f32 %v2650_v59, %v750_v45  ;;  %v1521_v4 = vadd.f32 %v2714_v37, %v1135_v3  ;;  %v2780_v44 = vrot.slane %v1588_v31, 11  ;;  %v781_v25 = vmul.f32 %v3407_v30, %v630_v22 }
 0x1cd   : > { %v782_v55 = vmul.f32 %v3407_v30, %v694_v2  ;;  %v847_v38 = vmul.f32 %v3410_v34, %v630_v22  ;;  %v848_v17 = vmul.f32 %v3410_v34, %v694_v2  ;;  %v1233_v21 = vmul.f32 %v3412_v35, %v630_v22 }
 0x1ce   : > { %v1522_v9 = vadd.f32 %v2715_v6, %v1136_v51  ;;  %v1907_v13 = vadd.f32 %v2779_v53, %v1521_v4  ;;  %v1234_v29 = vmul.f32 %v3412_v35, %v694_v2  ;;  %v1619_v40 = vmul.f32 %v3416_v41, %v630_v22 }
 0x1cf   : > { %v1620_v18 = vmul.f32 %v3416_v41, %v694_v2  ;;  %v2681_v54 = vrot.slane %v847_v38, 9  ;;  %v2682_v10 = vrot.slane %v848_v17, 9  ;;  %v2009_v33 = vadd.f32 %v3418_v42, %v1943_v57 }
 0x1d0   : > { %v1908_v36 = vadd.f32 %v2780_v44, %v1522_v9  ;;  %v1973_v52 = vadd.f32 %v3418_v42, %v1907_v13  ;;  %v2010_v20 = vadd.f32 %v3418_v42, %v1944_v16  ;;  %v2746_v45 = vrot.slane %v1233_v21, 10 }
 0x1d1   : > { %v2747_v50 = vrot.slane %v1234_v29, 10  ;;  %v1167_v3 = vadd.f32 %v2681_v54, %v781_v25  ;;  %v1168_v48 = vadd.f32 %v2682_v10, %v782_v55  ;;  %v2218_v22 = vrot.slane %v2042_v15, %v3424_v46 }
 0x1d2   : > { %v1974_v37 = vadd.f32 %v3418_v42, %v1908_v36  ;;  %v2037_v59 = vmax.f32 %v1973_v52, 0.0  ;;  %v2811_v31 = vrot.slane %v1619_v40, 11  ;;  %v2812_v2 = vrot.slane %v1620_v18, 11  ;;  %v3795_v52 = vld [vmem:[%s4195_s2] ss:$0 sm:$0xff] }
 0x1d3   : > { %v619_v51 = vmax.f32 %v523_v23, 0.0  ;;  %v1553_v53 = vadd.f32 %v2746_v45, %v1167_v3  ;;  %v1554_v44 = vadd.f32 %v2747_v50, %v1168_v48  ;;  %v2073_v57 = vmax.f32 %v2009_v33, 0.0 }
 0x1d4   : > { %v2038_v6 = vmax.f32 %v1974_v37, 0.0  ;;  %v2198_v4 = vrot.slane %v2037_v59, %v3424_v46  ;;  %v2074_v9 = vmax.f32 %v2010_v20, 0.0  ;;  %v2453_v3 = vsel %vm2411_vm0, %v3752_v19, %v3749_v8 }
 0x1d5   : > { %v683_v16 = vcombine.high %v619_v51, %v619_v51  ;;  %v825_v13 = vmul.f32 %v3410_v34, %v619_v51  ;;  %v1939_v55 = vadd.f32 %v2811_v31, %v1553_v53  ;;  %v1940_v15 = vadd.f32 %v2812_v2, %v1554_v44 }
 0x1d6   : > { %v2202_v38 = vrot.slane %v2038_v6, %v3424_v46  ;;  %v2426_v25 = vsel %vm2413_vm1, %v2198_v4, %v3746_v12  ;;  %v759_v17 = vmul.f32 %v3407_v30, %v619_v51  ;;  %v1211_v29 = vmul.f32 %v3412_v35, %v619_v51 }
 0x1d7   : > { %v826_v23 = vmul.f32 %v3410_v34, %v683_v16  ;;  %v2659_v21 = vrot.slane %v825_v13, 9  ;;  %v2005_v18 = vadd.f32 %v3418_v42, %v1939_v55  ;;  %v2006_v36 = vadd.f32 %v3418_v42, %v1940_v15 }
 0x1d8   : > { %v2427_v40 = vsel %vm2415_vm2, %v2202_v38, %v2426_v25  ;;  %v587_v12 = vadd.f32 %v3795_v52, %v3480_v56  ;;  %v760_v10 = vmul.f32 %v3407_v30, %v683_v16  ;;  %v1212_v59 = vmul.f32 %v3412_v35, %v683_v16 }
 0x1d9   : > { %v2428_v54 = vsel %vm2417_vm3, %v3706_v11, %v2427_v40  ;;  %v2660_v33 = vrot.slane %v826_v23, 9  ;;  %v1145_v20 = vadd.f32 %v2659_v21, %v759_v17  ;;  %v2069_v50 = vmax.f32 %v2005_v18, 0.0 }
 0x1da   : > { %v2429_v45 = vsel %vm2419_vm4, %v3709_v43, %v2428_v54  ;;  %v2070_v37 = vmax.f32 %v2006_v36, 0.0  ;;  %v2724_v11 = vrot.slane %v1211_v29, 10  ;;  %v1597_v48 = vmul.f32 %v3416_v41, %v619_v51 }
 0x1db   : > { %v2430_v56 = vsel %vm2421_vm5, %v3766_v60, %v2429_v45  ;;  %v2326_v2 = vrot.slane %v2069_v50, %v3424_v46  ;;  %v1146_v6 = vadd.f32 %v2660_v33, %v760_v10  ;;  %v2338_v4 = vrot.slane %v2072_v14, %v3424_v46 }
 0x1dc   : > { %v2431_v31 = vsel %vm2423_vm6, %v2218_v22, %v2430_v56  ;;  %v2330_v43 = vrot.slane %v2070_v37, %v3424_v46  ;;  %v1531_v53 = vadd.f32 %v2724_v11, %v1145_v20  ;;  %v635_v8 = vmax.f32 %v587_v12, 0.0 }
 0x1dd   : > { %2483 = vst [vmem:[%s3642_s8 + $0x8] sm:$0xff] %v2431_v31  ;;  %v515_v19 = vadd.f32 %v3795_v52, %v3483_v61  ;;  %v2342_v60 = vrot.slane %v2073_v57, %v3424_v46  ;;  %v2346_v51 = vrot.slane %v2074_v9, %v3424_v46  ;;  %v2454_v22 = vsel %vm2413_vm1, %v2326_v2, %v2453_v3 }
 0x1de   : > { %v2725_v44 = vrot.slane %v1212_v59, 10  ;;  %v2455_v13 = vsel %vm2415_vm2, %v2330_v43, %v2454_v22  ;;  %v1598_v38 = vmul.f32 %v3416_v41, %v683_v16  ;;  %v2789_v25 = vrot.slane %v1597_v48, 11 }
 0x1df   : > { %v699_v28 = vcombine.high %v635_v8, %v635_v8  ;;  %v2456_v14 = vsel %vm2417_vm3, %v3740_v39, %v2455_v13  ;;  %v857_v61 = vmul.f32 %v3410_v34, %v635_v8  ;;  %v579_v57 = vadd.f32 %v3795_v52, %v3485_v62 }
 0x1e0   : > { %v1532_v55 = vadd.f32 %v2725_v44, %v1146_v6  ;;  %v2457_v9 = vsel %vm2419_vm4, %v2338_v4, %v2456_v14  ;;  %v1917_v15 = vadd.f32 %v2789_v25, %v1531_v53  ;;  %v617_v23 = vmax.f32 %v515_v19, 0.0 }
 0x1e1   : > { %v858_v17 = vmul.f32 %v3410_v34, %v699_v28  ;;  %v2458_v16 = vsel %vm2421_vm5, %v2342_v60, %v2457_v9  ;;  %v2691_v21 = vrot.slane %v857_v61, 9  ;;  %v1243_v29 = vmul.f32 %v3412_v35, %v635_v8 }
 0x1e2   : > { %v2459_v40 = vsel %vm2423_vm6, %v2346_v51, %v2458_v16  ;;  %v2790_v39 = vrot.slane %v1598_v38, 11  ;;  %v1244_v36 = vmul.f32 %v3412_v35, %v699_v28  ;;  %v791_v62 = vmul.f32 %v3407_v30, %v635_v8 }
 0x1e3   : > { %v2692_v18 = vrot.slane %v858_v17, 9  ;;  %2487 = vst [vmem:[%s3642_s8 + $0x28] sm:$0xff] %v2459_v40  ;;  %v792_v12 = vmul.f32 %v3407_v30, %v699_v28  ;;  %v3840_v10 = vadd.f32 %v3418_v42, %v1917_v15  ;;  %v681_v33 = vcombine.high %v617_v23, %v617_v23 }
 0x1e4   : > { %v1918_v54 = vadd.f32 %v2790_v39, %v1532_v55  ;;  %v633_v20 = vmax.f32 %v579_v57, 0.0  ;;  %v1177_v45 = vadd.f32 %v2691_v21, %v791_v62  ;;  %v2756_v37 = vrot.slane %v1243_v29, 10 }
 0x1e5   : > { %v1178_v50 = vadd.f32 %v2692_v18, %v792_v12  ;;  %v821_v59 = vmul.f32 %v3410_v34, %v617_v23  ;;  %v2757_v3 = vrot.slane %v1244_v36, 10  ;;  %v1629_v56 = vmul.f32 %v3416_v41, %v635_v8 }
 0x1e6   : > { %v1630_v11 = vmul.f32 %v3416_v41, %v699_v28  ;;  %v822_v48 = vmul.f32 %v3410_v34, %v681_v33  ;;  %v755_v31 = vmul.f32 %v3407_v30, %v617_v23  ;;  %v1207_v43 = vmul.f32 %v3412_v35, %v617_v23 }
 0x1e7   : > { %v2655_v2 = vrot.slane %v821_v59, 9  ;;  %v1208_v6 = vmul.f32 %v3412_v35, %v681_v33  ;;  %v756_v4 = vmul.f32 %v3407_v30, %v681_v33  ;;  %v1594_v19 = vmul.f32 %v3416_v41, %v681_v33 }
 0x1e8   : > { %v2656_v53 = vrot.slane %v822_v48, 9  ;;  %v526_v60 = vadd.f32 %v3795_v52, %v3490_v5  ;;  %v3854_v8 = vadd.f32 %v3418_v42, %v1918_v54  ;;  %v1563_v51 = vadd.f32 %v2756_v37, %v1177_v45 }
 0x1e9   : > { %v1564_v22 = vadd.f32 %v2757_v3, %v1178_v50  ;;  %v1141_v44 = vadd.f32 %v2655_v2, %v755_v31  ;;  %v2047_v13 = vmax.f32 %v3840_v10, 0.0  ;;  %v2821_v38 = vrot.slane %v1629_v56, 11 }
 0x1ea   : > { %v1142_v25 = vadd.f32 %v2656_v53, %v756_v4  ;;  %v2721_v28 = vrot.slane %v1208_v6, 10  ;;  %v2822_v14 = vrot.slane %v1630_v11, 11  ;;  %v2720_v55 = vrot.slane %v1207_v43, 10 }
 0x1eb   : > { %v1593_v61 = vmul.f32 %v3416_v41, %v617_v23  ;;  %v697_v57 = vcombine.high %v633_v20, %v633_v20  ;;  %v2786_v15 = vrot.slane %v1594_v19, 11  ;;  %v853_v5 = vmul.f32 %v3410_v34, %v633_v20 }
 0x1ec   : > { %v1528_v9 = vadd.f32 %v2721_v28, %v1142_v25  ;;  %v1239_v17 = vmul.f32 %v3412_v35, %v633_v20  ;;  %v1949_v16 = vadd.f32 %v2821_v38, %v1563_v51  ;;  %v1950_v21 = vadd.f32 %v2822_v14, %v1564_v22 }
 0x1ed   : > { %v1527_v29 = vadd.f32 %v2720_v55, %v1141_v44  ;;  %v854_v40 = vmul.f32 %v3410_v34, %v697_v57  ;;  %v787_v18 = vmul.f32 %v3407_v30, %v633_v20  ;;  %v2687_v36 = vrot.slane %v853_v5, 9 }
 0x1ee   : > { %v1914_v39 = vadd.f32 %v2786_v15, %v1528_v9  ;;  %v1240_v62 = vmul.f32 %v3412_v35, %v697_v57  ;;  %v2785_v12 = vrot.slane %v1593_v61, 11  ;;  %v788_v23 = vmul.f32 %v3407_v30, %v697_v57 }
 0x1ef   : > { %v2688_v54 = vrot.slane %v854_v40, 9  ;;  %v1625_v33 = vmul.f32 %v3416_v41, %v633_v20  ;;  %v2048_v45 = vmax.f32 %v3854_v8, 0.0  ;;  %v1173_v50 = vadd.f32 %v2687_v36, %v787_v18 }
 0x1f0   : > { %v2752_v37 = vrot.slane %v1239_v17, 10  ;;  %v1626_v59 = vmul.f32 %v3416_v41, %v697_v57  ;;  %v1913_v3 = vadd.f32 %v2785_v12, %v1527_v29  ;;  %v2753_v11 = vrot.slane %v1240_v62, 10 }
 0x1f1   : > { %v1174_v56 = vadd.f32 %v2688_v54, %v788_v23  ;;  %v620_v48 = vmax.f32 %v526_v60, 0.0  ;;  %v3868_v31 = vadd.f32 %v3418_v42, %v1949_v16  ;;  %v1980_v2 = vadd.f32 %v3418_v42, %v1914_v39 }
 0x1f2   : > { %v1559_v43 = vadd.f32 %v2752_v37, %v1173_v50  ;;  %v2817_v6 = vrot.slane %v1625_v33, 11  ;;  %v3872_v4 = vadd.f32 %v3418_v42, %v1950_v21  ;;  %v2818_v53 = vrot.slane %v1626_v59, 11 }
 0x1f3   : > { %v1560_v20 = vadd.f32 %v2753_v11, %v1174_v56  ;;  %v684_v19 = vcombine.high %v620_v48, %v620_v48  ;;  %v827_v51 = vmul.f32 %v3410_v34, %v620_v48  ;;  %v1213_v22 = vmul.f32 %v3412_v35, %v620_v48 }
 0x1f4   : > { %v1945_v8 = vadd.f32 %v2817_v6, %v1559_v43  ;;  %v590_v60 = vadd.f32 %v3795_v52, %v3512_v32  ;;  %v1979_v44 = vadd.f32 %v3418_v42, %v1913_v3  ;;  %v2044_v14 = vmax.f32 %v1980_v2, 0.0 }
 0x1f5   : > { %v1946_v38 = vadd.f32 %v2818_v53, %v1560_v20  ;;  %v828_v25 = vmul.f32 %v3410_v34, %v684_v19  ;;  %v1214_v28 = vmul.f32 %v3412_v35, %v684_v19  ;;  %v761_v55 = vmul.f32 %v3407_v30, %v620_v48 }
 0x1f6   : > { %v762_v61 = vmul.f32 %v3407_v30, %v684_v19  ;;  %v2661_v57 = vrot.slane %v827_v51, 9  ;;  %v2011_v9 = vadd.f32 %v3418_v42, %v1945_v8  ;;  %v1599_v32 = vmul.f32 %v3416_v41, %v620_v48 }
 0x1f7   : > { %v2012_v15 = vadd.f32 %v3418_v42, %v1946_v38  ;;  %v2662_v5 = vrot.slane %v828_v25, 9  ;;  %v2726_v16 = vrot.slane %v1213_v22, 10  ;;  %v1600_v21 = vmul.f32 %v3416_v41, %v684_v19 }
 0x1f8   : > { %v1147_v17 = vadd.f32 %v2661_v57, %v761_v55  ;;  %v636_v29 = vmax.f32 %v590_v60, 0.0  ;;  %v2043_v40 = vmax.f32 %v1979_v44, 0.0  ;;  %v2727_v36 = vrot.slane %v1214_v28, 10 }
 0x1f9   : > { %v2076_v39 = vmax.f32 %v2012_v15, 0.0  ;;  %v1148_v18 = vadd.f32 %v2662_v5, %v762_v61  ;;  %v2226_v62 = vrot.slane %v2044_v14, %v3424_v46  ;;  %v2791_v23 = vrot.slane %v1599_v32, 11 }
 0x1fa   : > { %v1533_v12 = vadd.f32 %v2726_v16, %v1147_v17  ;;  %v700_v54 = vcombine.high %v636_v29, %v636_v29  ;;  %v2075_v33 = vmax.f32 %v2011_v9, 0.0  ;;  %v2792_v37 = vrot.slane %v1600_v21, 11 }
 0x1fb   : > { %v1534_v50 = vadd.f32 %v2727_v36, %v1148_v18  ;;  %v859_v59 = vmul.f32 %v3410_v34, %v636_v29  ;;  %v3892_v3 = vrot.slane %v2047_v13, %v3424_v46  ;;  %v518_v48 = vadd.f32 %v3795_v52, %v3538_v27 }
 0x1fc   : > { %v1919_v56 = vadd.f32 %v2791_v23, %v1533_v12  ;;  %v860_v11 = vmul.f32 %v3410_v34, %v700_v54  ;;  %v2222_v2 = vrot.slane %v2043_v40, %v3424_v46  ;;  %v2354_v43 = vrot.slane %v2076_v39, %v3424_v46 }
 0x1fd   : > { %v1920_v6 = vadd.f32 %v2792_v37, %v1534_v50  ;;  %v1245_v20 = vmul.f32 %v3412_v35, %v636_v29  ;;  %v3901_v53 = vrot.slane %v2048_v45, %v3424_v46  ;;  %v2079_v10 = vmax.f32 %v3868_v31, 0.0 }
 0x1fe   : > { %v2693_v13 = vrot.slane %v859_v59, 9  ;;  %v1246_v19 = vmul.f32 %v3412_v35, %v700_v54  ;;  %v2080_v8 = vmax.f32 %v3872_v4, 0.0  ;;  %v3907_v51 = vsel %vm2411_vm0, %v2226_v62, %v2222_v2 }
 0x1ff   : > { %v2350_v27 = vrot.slane %v2075_v33, %v3424_v46  ;;  %v1985_v22 = vadd.f32 %v3418_v42, %v1919_v56  ;;  %v793_v60 = vmul.f32 %v3407_v30, %v636_v29  ;;  %v2694_v44 = vrot.slane %v860_v11, 9 }
 0x200   : > { %v1631_v45 = vmul.f32 %v3416_v41, %v636_v29  ;;  %v618_v38 = vmax.f32 %v518_v48, 0.0  ;;  %v3917_v28 = vadd.f32 %v3418_v42, %v1920_v6  ;;  %v794_v14 = vmul.f32 %v3407_v30, %v700_v54 }
 0x201   : > { %v3914_v25 = vsel %vm2411_vm0, %v2354_v43, %v2350_v27  ;;  %v2758_v55 = vrot.slane %v1245_v20, 10  ;;  %v1179_v61 = vadd.f32 %v2693_v13, %v793_v60  ;;  %v2759_v57 = vrot.slane %v1246_v19, 10 }
 0x202   : > { %v1632_v9 = vmul.f32 %v3416_v41, %v700_v54  ;;  %v682_v15 = vcombine.high %v618_v38, %v618_v38  ;;  %v2049_v5 = vmax.f32 %v1985_v22, 0.0  ;;  %v823_v32 = vmul.f32 %v3410_v34, %v618_v38 }
 0x203   : > { %v1209_v17 = vmul.f32 %v3412_v35, %v618_v38  ;;  %v582_v16 = vadd.f32 %v3795_v52, %v3551_v1  ;;  %v1180_v21 = vadd.f32 %v2694_v44, %v794_v14  ;;  %v2823_v29 = vrot.slane %v1631_v45, 11 }
 0x204   : > { %v824_v40 = vmul.f32 %v3410_v34, %v682_v15  ;;  %v1210_v39 = vmul.f32 %v3412_v35, %v682_v15  ;;  %v2050_v18 = vmax.f32 %v3917_v28, 0.0  ;;  %v757_v36 = vmul.f32 %v3407_v30, %v618_v38 }
 0x205   : > { %v2657_v62 = vrot.slane %v823_v32, 9  ;;  %v1595_v12 = vmul.f32 %v3416_v41, %v618_v38  ;;  %v1565_v23 = vadd.f32 %v2758_v55, %v1179_v61  ;;  %v758_v54 = vmul.f32 %v3407_v30, %v682_v15 }
 0x206   : > { %v2658_v33 = vrot.slane %v824_v40, 9  ;;  %v1596_v50 = vmul.f32 %v3416_v41, %v682_v15  ;;  %v2824_v1 = vrot.slane %v1632_v9, 11  ;;  %v2722_v59 = vrot.slane %v1209_v17, 10 }
 0x207   : > { %v1143_v37 = vadd.f32 %v2657_v62, %v757_v36  ;;  %v634_v56 = vmax.f32 %v582_v16, 0.0  ;;  %v2246_v11 = vrot.slane %v2049_v5, %v3424_v46  ;;  %v1566_v48 = vadd.f32 %v2759_v57, %v1180_v21 }
 0x208   : > { %v1144_v2 = vadd.f32 %v2658_v33, %v758_v54  ;;  %v2723_v43 = vrot.slane %v1210_v39, 10  ;;  %v2787_v20 = vrot.slane %v1595_v12, 11  ;;  %v2788_v13 = vrot.slane %v1596_v50, 11 }
 0x209   : > { %v1529_v6 = vadd.f32 %v2722_v59, %v1143_v37  ;;  %v698_v19 = vcombine.high %v634_v56, %v634_v56  ;;  %v855_v22 = vmul.f32 %v3410_v34, %v634_v56  ;;  %v1241_v60 = vmul.f32 %v3412_v35, %v634_v56 }
 0x20a   : > { %v1530_v27 = vadd.f32 %v2723_v43, %v1144_v2  ;;  %v539_v44 = vadd.f32 %v3795_v52, %v3589_v49  ;;  %v1951_v45 = vadd.f32 %v2823_v29, %v1565_v23  ;;  %v789_v61 = vmul.f32 %v3407_v30, %v634_v56 }
 0x20b   : > { %v1915_v38 = vadd.f32 %v2787_v20, %v1529_v6  ;;  %v856_v28 = vmul.f32 %v3410_v34, %v698_v19  ;;  %v1242_v14 = vmul.f32 %v3412_v35, %v698_v19  ;;  %v2689_v57 = vrot.slane %v855_v22, 9 }
 0x20c   : > { %v1916_v55 = vadd.f32 %v2788_v13, %v1530_v27  ;;  %v1627_v9 = vmul.f32 %v3416_v41, %v634_v56  ;;  %v790_v5 = vmul.f32 %v3407_v30, %v698_v19  ;;  %v1628_v17 = vmul.f32 %v3416_v41, %v698_v19 }
 0x20d   : > { %v1981_v15 = vadd.f32 %v3418_v42, %v1915_v38  ;;  %v2690_v32 = vrot.slane %v856_v28, 9  ;;  %v1175_v16 = vadd.f32 %v2689_v57, %v789_v61  ;;  %v2754_v21 = vrot.slane %v1241_v60, 10 }
 0x20e   : > { %v1982_v49 = vadd.f32 %v3418_v42, %v1916_v55  ;;  %v623_v29 = vmax.f32 %v539_v44, 0.0  ;;  %v1952_v40 = vadd.f32 %v2824_v1, %v1566_v48  ;;  %v2755_v62 = vrot.slane %v1242_v14, 10 }
 0x20f   : > { %v2045_v39 = vmax.f32 %v1981_v15, 0.0  ;;  %v1176_v36 = vadd.f32 %v2690_v32, %v790_v5  ;;  %v1561_v23 = vadd.f32 %v2754_v21, %v1175_v16  ;;  %v2819_v54 = vrot.slane %v1627_v9, 11 }
 0x210   : > { %v2046_v12 = vmax.f32 %v1982_v49, 0.0  ;;  %v687_v33 = vcombine.high %v623_v29, %v623_v29  ;;  %v2820_v59 = vrot.slane %v1628_v17, 11  ;;  %v833_v56 = vmul.f32 %v3410_v34, %v623_v29 }
 0x211   : > { %v2230_v50 = vrot.slane %v2045_v39, %v3424_v46  ;;  %v1562_v37 = vadd.f32 %v2755_v62, %v1176_v36  ;;  %v2017_v2 = vadd.f32 %v3418_v42, %v1951_v45  ;;  %v1947_v6 = vadd.f32 %v2819_v54, %v1561_v23 }
 0x212   : > { %v2234_v43 = vrot.slane %v2046_v12, %v3424_v46  ;;  %v834_v1 = vmul.f32 %v3410_v34, %v687_v33  ;;  %v2250_v48 = vrot.slane %v2050_v18, %v3424_v46  ;;  %v2667_v19 = vrot.slane %v833_v56, 9 }
 0x213   : > { %v2433_v20 = vsel %vm2413_vm1, %v2230_v50, %v3907_v51  ;;  %v1948_v13 = vadd.f32 %v2820_v59, %v1562_v37  ;;  %v2018_v27 = vadd.f32 %v3418_v42, %v1952_v40  ;;  %v2013_v60 = vadd.f32 %v3418_v42, %v1947_v6 }
 0x214   : > { %v2434_v22 = vsel %vm2415_vm2, %v2234_v43, %v2433_v20  ;;  %v767_v44 = vmul.f32 %v3407_v30, %v623_v29  ;;  %v2668_v18 = vrot.slane %v834_v1, 9  ;;  %v1219_v28 = vmul.f32 %v3412_v35, %v623_v29 }
 0x215   : > { %v2435_v45 = vsel %vm2417_vm3, %v3892_v3, %v2434_v22  ;;  %v2014_v38 = vadd.f32 %v3418_v42, %v1948_v13  ;;  %v2081_v51 = vmax.f32 %v2017_v2, 0.0  ;;  %v2077_v55 = vmax.f32 %v2013_v60, 0.0 }
 0x216   : > { %v2436_v14 = vsel %vm2419_vm4, %v3901_v53, %v2435_v45  ;;  %v768_v61 = vmul.f32 %v3407_v30, %v687_v33  ;;  %v1153_v15 = vadd.f32 %v2667_v19, %v767_v44  ;;  %v1220_v5 = vmul.f32 %v3412_v35, %v687_v33 }
 0x217   : > { %v2437_v57 = vsel %vm2421_vm5, %v2246_v11, %v2436_v14  ;;  %v2078_v9 = vmax.f32 %v2014_v38, 0.0  ;;  %v2082_v3 = vmax.f32 %v2018_v27, 0.0  ;;  %v2358_v17 = vrot.slane %v2077_v55, %v3424_v46 }
 0x218   : > { %v2438_v32 = vsel %vm2423_vm6, %v2250_v48, %v2437_v57  ;;  %v603_v49 = vadd.f32 %v3795_v52, %v3605_v0  ;;  %v1154_v16 = vadd.f32 %v2668_v18, %v768_v61  ;;  %v2732_v21 = vrot.slane %v1219_v28, 10 }
 0x219   : > { %2484 = vst [vmem:[%s3642_s8 + $0x10] sm:$0xff] %v2438_v32  ;;  %v2362_v53 = vrot.slane %v2078_v9, %v3424_v46  ;;  %v1605_v40 = vmul.f32 %v3416_v41, %v623_v29  ;;  %v2366_v11 = vrot.slane %v2079_v10, %v3424_v46  ;;  %v2370_v39 = vrot.slane %v2080_v8, %v3424_v46 }
 0x21a   : > { %v2461_v36 = vsel %vm2413_vm1, %v2358_v17, %v3914_v25  ;;  %v2733_v62 = vrot.slane %v1220_v5, 10  ;;  %v1539_v12 = vadd.f32 %v2732_v21, %v1153_v15  ;;  %v1606_v23 = vmul.f32 %v3416_v41, %v687_v33 }
 0x21b   : > { %v2462_v0 = vsel %vm2415_vm2, %v2362_v53, %v2461_v36  ;;  %v2374_v29 = vrot.slane %v2081_v51, %v3424_v46  ;;  %v2378_v54 = vrot.slane %v2082_v3, %v3424_v46  ;;  %v639_v10 = vmax.f32 %v603_v49, 0.0 }
 0x21c   : > { %v2463_v31 = vsel %vm2417_vm3, %v2366_v11, %v2462_v0  ;;  %v1540_v8 = vadd.f32 %v2733_v62, %v1154_v16  ;;  %v2797_v50 = vrot.slane %v1605_v40, 11  ;;  %v531_v25 = vadd.f32 %v3795_v52, %v3640_v47 }
 0x21d   : > { %v2464_v4 = vsel %vm2419_vm4, %v2370_v39, %v2463_v31  ;;  %v2798_v56 = vrot.slane %v1606_v23, 11  ;;  %v703_v2 = vcombine.high %v639_v10, %v639_v10  ;;  %v595_v43 = vadd.f32 %v3795_v52, %v3655_v58 }
 0x21e   : > { %v2465_v37 = vsel %vm2421_vm5, %v2374_v29, %v2464_v4  ;;  %v1925_v33 = vadd.f32 %v2797_v50, %v1539_v12  ;;  %v621_v1 = vmax.f32 %v531_v25, 0.0  ;;  %v865_v48 = vmul.f32 %v3410_v34, %v639_v10 }
 0x21f   : > { %v2466_v59 = vsel %vm2423_vm6, %v2378_v54, %v2465_v37  ;;  %v1926_v6 = vadd.f32 %v2798_v56, %v1540_v8  ;;  %v799_v47 = vmul.f32 %v3407_v30, %v639_v10  ;;  %v542_v19 = vadd.f32 %v3795_v52, %v3674_v24 }
 0x220   : > { %2488 = vst [vmem:[%s3642_s8 + $0x30] sm:$0xff] %v2466_v59  ;;  %v3996_v20 = vadd.f32 %v3418_v42, %v1925_v33  ;;  %v685_v13 = vcombine.high %v621_v1, %v621_v1  ;;  %v866_v27 = vmul.f32 %v3410_v34, %v703_v2  ;;  %v1251_v22 = vmul.f32 %v3412_v35, %v639_v10 }
 0x221   : > { %v829_v60 = vmul.f32 %v3410_v34, %v621_v1  ;;  %v637_v58 = vmax.f32 %v595_v43, 0.0  ;;  %v4005_v44 = vadd.f32 %v3418_v42, %v1926_v6  ;;  %v800_v45 = vmul.f32 %v3407_v30, %v703_v2 }
 0x222   : > { %v830_v38 = vmul.f32 %v3410_v34, %v685_v13  ;;  %v1216_v18 = vmul.f32 %v3412_v35, %v685_v13  ;;  %v2699_v28 = vrot.slane %v865_v48, 9  ;;  %v763_v51 = vmul.f32 %v3407_v30, %v621_v1 }
 0x223   : > { %v2663_v24 = vrot.slane %v829_v60, 9  ;;  %v1215_v14 = vmul.f32 %v3412_v35, %v621_v1  ;;  %v2055_v55 = vmax.f32 %v3996_v20, 0.0  ;;  %v764_v61 = vmul.f32 %v3407_v30, %v685_v13 }
 0x224   : > { %v2664_v57 = vrot.slane %v830_v38, 9  ;;  %v1602_v9 = vmul.f32 %v3416_v41, %v685_v13  ;;  %v2700_v15 = vrot.slane %v866_v27, 9  ;;  %v1252_v5 = vmul.f32 %v3412_v35, %v703_v2 }
 0x225   : > { %v1149_v3 = vadd.f32 %v2663_v24, %v763_v51  ;;  %v701_v32 = vcombine.high %v637_v58, %v637_v58  ;;  %v2764_v17 = vrot.slane %v1251_v22, 10  ;;  %v2729_v53 = vrot.slane %v1216_v18, 10 }
 0x226   : > { %v1150_v49 = vadd.f32 %v2664_v57, %v764_v61  ;;  %v861_v16 = vmul.f32 %v3410_v34, %v637_v58  ;;  %v1185_v21 = vadd.f32 %v2699_v28, %v799_v47  ;;  %v2728_v40 = vrot.slane %v1215_v14, 10 }
 0x227   : > { %v1601_v11 = vmul.f32 %v3416_v41, %v621_v1  ;;  %v862_v39 = vmul.f32 %v3410_v34, %v701_v32  ;;  %v1637_v36 = vmul.f32 %v3416_v41, %v639_v10  ;;  %v2794_v62 = vrot.slane %v1602_v9, 11 }
 0x228   : > { %v1536_v0 = vadd.f32 %v2729_v53, %v1150_v49  ;;  %v624_v12 = vmax.f32 %v542_v19, 0.0  ;;  %v1535_v23 = vadd.f32 %v2728_v40, %v1149_v3  ;;  %v796_v29 = vmul.f32 %v3407_v30, %v701_v32 }
 0x229   : > { %v2696_v54 = vrot.slane %v862_v39, 9  ;;  %v1248_v31 = vmul.f32 %v3412_v35, %v701_v32  ;;  %v1186_v4 = vadd.f32 %v2700_v15, %v800_v45  ;;  %v2765_v8 = vrot.slane %v1252_v5, 10 }
 0x22a   : > { %v1922_v50 = vadd.f32 %v2794_v62, %v1536_v0  ;;  %v2695_v25 = vrot.slane %v861_v16, 9  ;;  %v1571_v37 = vadd.f32 %v2764_v17, %v1185_v21  ;;  %v1638_v59 = vmul.f32 %v3416_v41, %v703_v2 }
 0x22b   : > { %v2793_v56 = vrot.slane %v1601_v11, 11  ;;  %v1182_v33 = vadd.f32 %v2696_v54, %v796_v29  ;;  %v2829_v43 = vrot.slane %v1637_v36, 11  ;;  %v795_v10 = vmul.f32 %v3407_v30, %v637_v58 }
 0x22c   : > { %v1247_v6 = vmul.f32 %v3412_v35, %v637_v58  ;;  %v688_v1 = vcombine.high %v624_v12, %v624_v12  ;;  %v2761_v47 = vrot.slane %v1248_v31, 10  ;;  %v1634_v13 = vmul.f32 %v3416_v41, %v701_v32 }
 0x22d   : > { %v1921_v48 = vadd.f32 %v2793_v56, %v1535_v23  ;;  %v835_v19 = vmul.f32 %v3410_v34, %v624_v12  ;;  %v1572_v27 = vadd.f32 %v2765_v8, %v1186_v4  ;;  %v1988_v22 = vadd.f32 %v3418_v42, %v1922_v50 }
 0x22e   : > { %v1181_v60 = vadd.f32 %v2695_v25, %v795_v10  ;;  %v836_v2 = vmul.f32 %v3410_v34, %v688_v1  ;;  %v1568_v45 = vadd.f32 %v2761_v47, %v1182_v33  ;;  %v769_v38 = vmul.f32 %v3407_v30, %v624_v12 }
 0x22f   : > { %v2669_v18 = vrot.slane %v835_v19, 9  ;;  %v1221_v28 = vmul.f32 %v3412_v35, %v624_v12  ;;  %v1633_v51 = vmul.f32 %v3416_v41, %v637_v58  ;;  %v770_v24 = vmul.f32 %v3407_v30, %v688_v1 }
 0x230   : > { %v2670_v14 = vrot.slane %v836_v2, 9  ;;  %v1222_v61 = vmul.f32 %v3412_v35, %v688_v1  ;;  %v1987_v57 = vadd.f32 %v3418_v42, %v1921_v48  ;;  %v2760_v9 = vrot.slane %v1247_v6, 10 }
 0x231   : > { %v2826_v15 = vrot.slane %v1634_v13, 11  ;;  %v1155_v5 = vadd.f32 %v2669_v18, %v769_v38  ;;  %v2734_v32 = vrot.slane %v1221_v28, 10  ;;  %v1607_v49 = vmul.f32 %v3416_v41, %v624_v12 }
 0x232   : > { %v1156_v3 = vadd.f32 %v2670_v14, %v770_v24  ;;  %v2735_v17 = vrot.slane %v1222_v61, 10  ;;  %v2052_v53 = vmax.f32 %v1988_v22, 0.0  ;;  %v1567_v16 = vadd.f32 %v2760_v9, %v1181_v60 }
 0x233   : > { %v1954_v21 = vadd.f32 %v2826_v15, %v1568_v45  ;;  %v1608_v58 = vmul.f32 %v3416_v41, %v688_v1  ;;  %v1541_v40 = vadd.f32 %v2734_v32, %v1155_v5  ;;  %v606_v39 = vadd.f32 %v3795_v52, %v3689_v7 }
 0x234   : > { %v1542_v11 = vadd.f32 %v2735_v17, %v1156_v3  ;;  %v534_v36 = vadd.f32 %v3795_v52, %v3719_v63  ;;  %v2830_v0 = vrot.slane %v1638_v59, 11  ;;  %v1957_v62 = vadd.f32 %v2829_v43, %v1571_v37 }
 0x235   : > { %v2051_v23 = vmax.f32 %v1987_v57, 0.0  ;;  %v2825_v29 = vrot.slane %v1633_v51, 11  ;;  %v2799_v54 = vrot.slane %v1607_v49, 11  ;;  %v2800_v31 = vrot.slane %v1608_v58, 11 }
 0x236   : > { %v640_v12 = vmax.f32 %v606_v39, 0.0  ;;  %v622_v4 = vmax.f32 %v534_v36, 0.0  ;;  %v1958_v8 = vadd.f32 %v2830_v0, %v1572_v27  ;;  %v2258_v50 = vrot.slane %v2052_v53, %v3424_v46 }
 0x237   : > { %v1953_v25 = vadd.f32 %v2825_v29, %v1567_v16  ;;  %v4043_v56 = vadd.f32 %v3418_v42, %v1954_v21  ;;  %v1927_v33 = vadd.f32 %v2799_v54, %v1541_v40  ;;  %v1928_v7 = vadd.f32 %v2800_v31, %v1542_v11 }
 0x238   : > { %v704_v10 = vcombine.high %v640_v12, %v640_v12  ;;  %v598_v63 = vadd.f32 %v3795_v52, %v3728_v26  ;;  %v2056_v37 = vmax.f32 %v4005_v44, 0.0  ;;  %v4051_v59 = vrot.slane %v2055_v55, %v3424_v46 }
 0x239   : > { %v2254_v43 = vrot.slane %v2051_v23, %v3424_v46  ;;  %v867_v6 = vmul.f32 %v3410_v34, %v640_v12  ;;  %v4056_v1 = vadd.f32 %v3418_v42, %v1957_v62  ;;  %v1253_v47 = vmul.f32 %v3412_v35, %v640_v12 }
 0x23a   : > { %v868_v48 = vmul.f32 %v3410_v34, %v704_v10  ;;  %v686_v13 = vcombine.high %v622_v4, %v622_v4  ;;  %v4061_v26 = vadd.f32 %v3418_v42, %v1958_v8  ;;  %v4067_v20 = vadd.f32 %v3418_v42, %v1953_v25 }
 0x23b   : > { %v4064_v52 = vsel %vm2411_vm0, %v2258_v50, %v2254_v43  ;;  %v2084_v55 = vmax.f32 %v4043_v56, 0.0  ;;  %v4071_v19 = vadd.f32 %v3418_v42, %v1927_v33  ;;  %v4074_v27 = vadd.f32 %v3418_v42, %v1928_v7 }
 0x23c   : > { %v801_v22 = vmul.f32 %v3407_v30, %v640_v12  ;;  %v638_v60 = vmax.f32 %v598_v63, 0.0  ;;  %v2701_v2 = vrot.slane %v867_v6, 9  ;;  %v2702_v45 = vrot.slane %v868_v48, 9 }
 0x23d   : > { %v1254_v38 = vmul.f32 %v3412_v35, %v704_v10  ;;  %v1639_v18 = vmul.f32 %v3416_v41, %v640_v12  ;;  %v802_v28 = vmul.f32 %v3407_v30, %v704_v10  ;;  %v2766_v51 = vrot.slane %v1253_v47, 10 }
 0x23e   : > { %v831_v24 = vmul.f32 %v3410_v34, %v622_v4  ;;  %v832_v14 = vmul.f32 %v3410_v34, %v686_v13  ;;  %v765_v61 = vmul.f32 %v3407_v30, %v622_v4  ;;  %v766_v57 = vmul.f32 %v3407_v30, %v686_v13 }
 0x23f   : > { %v1217_v9 = vmul.f32 %v3412_v35, %v622_v4  ;;  %v1218_v15 = vmul.f32 %v3412_v35, %v686_v13  ;;  %v1603_v32 = vmul.f32 %v3416_v41, %v622_v4  ;;  %v1604_v17 = vmul.f32 %v3416_v41, %v686_v13 }
 0x240   : > { %v2665_v5 = vrot.slane %v831_v24, 9  ;;  %v2666_v3 = vrot.slane %v832_v14, 9  ;;  %v1187_v49 = vadd.f32 %v2701_v2, %v801_v22  ;;  %v1188_v53 = vadd.f32 %v2702_v45, %v802_v28 }
 0x241   : > { %v2767_v16 = vrot.slane %v1254_v38, 10  ;;  %v1640_v21 = vmul.f32 %v3416_v41, %v704_v10  ;;  %v2730_v11 = vrot.slane %v1217_v9, 10  ;;  %v2731_v39 = vrot.slane %v1218_v15, 10 }
 0x242   : > { %v1151_v58 = vadd.f32 %v2665_v5, %v765_v61  ;;  %v1152_v40 = vadd.f32 %v2666_v3, %v766_v57  ;;  %v2831_v36 = vrot.slane %v1639_v18, 11  ;;  %v702_v0 = vcombine.high %v638_v60, %v638_v60 }
 0x243   : > { %v863_v62 = vmul.f32 %v3410_v34, %v638_v60  ;;  %v1249_v23 = vmul.f32 %v3412_v35, %v638_v60  ;;  %v2795_v31 = vrot.slane %v1603_v32, 11  ;;  %v2796_v12 = vrot.slane %v1604_v17, 11 }
 0x244   : > { %v1537_v29 = vadd.f32 %v2730_v11, %v1151_v58  ;;  %v1538_v54 = vadd.f32 %v2731_v39, %v1152_v40  ;;  %v797_v4 = vmul.f32 %v3407_v30, %v638_v60  ;;  %v864_v8 = vmul.f32 %v3410_v34, %v702_v0 }
 0x245   : > { %v2697_v50 = vrot.slane %v863_v62, 9  ;;  %v1250_v25 = vmul.f32 %v3412_v35, %v702_v0  ;;  %v1573_v33 = vadd.f32 %v2766_v51, %v1187_v49  ;;  %v1574_v7 = vadd.f32 %v2767_v16, %v1188_v53 }
 0x246   : > { %v1923_v10 = vadd.f32 %v2795_v31, %v1537_v29  ;;  %v1924_v63 = vadd.f32 %v2796_v12, %v1538_v54  ;;  %v798_v43 = vmul.f32 %v3407_v30, %v702_v0  ;;  %v2698_v6 = vrot.slane %v864_v8, 9 }
 0x247   : > { %v1183_v48 = vadd.f32 %v2697_v50, %v797_v4  ;;  %v2762_v47 = vrot.slane %v1249_v23, 10  ;;  %v2832_v13 = vrot.slane %v1640_v21, 11  ;;  %v1635_v45 = vmul.f32 %v3416_v41, %v638_v60 }
 0x248   : > { %v1989_v22 = vadd.f32 %v3418_v42, %v1923_v10  ;;  %v1990_v2 = vadd.f32 %v3418_v42, %v1924_v63  ;;  %v1184_v34 = vadd.f32 %v2698_v6, %v798_v43  ;;  %v2763_v38 = vrot.slane %v1250_v25, 10 }
 0x249   : > { %v1569_v18 = vadd.f32 %v2762_v47, %v1183_v48  ;;  %v1636_v35 = vmul.f32 %v3416_v41, %v702_v0  ;;  %v1959_v28 = vadd.f32 %v2831_v36, %v1573_v33  ;;  %v2827_v14 = vrot.slane %v1635_v45, 11 }
 0x24a   : > { %v2053_v51 = vmax.f32 %v1989_v22, 0.0  ;;  %v2054_v24 = vmax.f32 %v1990_v2, 0.0  ;;  %v2083_v30 = vmax.f32 %v4067_v20, 0.0  ;;  %v1960_v61 = vadd.f32 %v2832_v13, %v1574_v7 }
 0x24b   : > { %v1570_v57 = vadd.f32 %v2763_v38, %v1184_v34  ;;  %v2828_v9 = vrot.slane %v1636_v35, 11  ;;  %v2057_v15 = vmax.f32 %v4071_v19, 0.0  ;;  %v1955_v3 = vadd.f32 %v2827_v14, %v1569_v18 }
 0x24c   : > { %v2262_v5 = vrot.slane %v2053_v51, %v3424_v46  ;;  %v2266_v60 = vrot.slane %v2054_v24, %v3424_v46  ;;  %v2274_v41 = vrot.slane %v2056_v37, %v3424_v46  ;;  %v2386_v32 = vrot.slane %v2084_v55, %v3424_v46 }
 0x24d   : > { %v2058_v20 = vmax.f32 %v4074_v27, 0.0  ;;  %v1956_v17 = vadd.f32 %v2828_v9, %v1570_v57  ;;  %v2087_v49 = vmax.f32 %v4056_v1, 0.0  ;;  %v2025_v19 = vadd.f32 %v3418_v42, %v1959_v28 }
 0x24e   : > { %v2440_v53 = vsel %vm2413_vm1, %v2262_v5, %v4064_v52  ;;  %v2021_v16 = vadd.f32 %v3418_v42, %v1955_v3  ;;  %v2382_v21 = vrot.slane %v2083_v30, %v3424_v46  ;;  %v2026_v44 = vadd.f32 %v3418_v42, %v1960_v61 }
 0x24f   : > { %v2441_v37 = vsel %vm2415_vm2, %v2266_v60, %v2440_v53  ;;  %v2022_v56 = vadd.f32 %v3418_v42, %v1956_v17  ;;  %v2088_v55 = vmax.f32 %v4061_v26, 0.0  ;;  %v2278_v1 = vrot.slane %v2057_v15, %v3424_v46 }
 0x250   : > { %v2442_v27 = vsel %vm2417_vm3, %v4051_v59, %v2441_v37  ;;  %v2085_v52 = vmax.f32 %v2021_v16, 0.0  ;;  %v2467_v58 = vsel %vm2411_vm0, %v2386_v32, %v2382_v21  ;;  %v2282_v40 = vrot.slane %v2058_v20, %v3424_v46 }
 0x251   : > { %v2443_v11 = vsel %vm2419_vm4, %v2274_v41, %v2442_v27  ;;  %v2086_v39 = vmax.f32 %v2022_v56, 0.0  ;;  %v2089_v36 = vmax.f32 %v2025_v19, 0.0  ;;  %v2090_v0 = vmax.f32 %v2026_v44, 0.0 }
 0x252   : > { %v2444_v42 = vsel %vm2421_vm5, %v2278_v1, %v2443_v11  ;;  %v2390_v26 = vrot.slane %v2085_v52, %v3424_v46  ;;  %v2398_v59 = vrot.slane %v2087_v49, %v3424_v46  ;;  %v2402_v54 = vrot.slane %v2088_v55, %v3424_v46 }
 0x253   : > { %v2445_v62 = vsel %vm2423_vm6, %v2282_v40, %v2444_v42  ;;  %v2394_v23 = vrot.slane %v2086_v39, %v3424_v46  ;;  %v2406_v12 = vrot.slane %v2089_v36, %v3424_v46  ;;  %v2410_v8 = vrot.slane %v2090_v0, %v3424_v46 }
 0x254   : > { %2485 = vst [vmem:[%s3642_s8 + $0x18] sm:$0xff] %v2445_v62  ;;  %v2468_v29 = vsel %vm2413_vm1, %v2390_v26, %v2467_v58 }
 0x255   : > { %v2469_v31 = vsel %vm2415_vm2, %v2394_v23, %v2468_v29 }
 0x256   : > { %v2470_v4 = vsel %vm2417_vm3, %v2398_v59, %v2469_v31 }
 0x257   : > { %v2471_v50 = vsel %vm2419_vm4, %v2402_v54, %v2470_v4 }
 0x258   : > { %v2472_v25 = vsel %vm2421_vm5, %v2406_v12, %v2471_v50 }
 0x259   : > { %v2473_v33 = vsel %vm2423_vm6, %v2410_v8, %v2472_v25 }
 0x25a   : > { %2489 = vst [vmem:[%s3642_s8 + $0x38] sm:$0xff] %v2473_v33 }
 0x25b   : > { %3112 = shalt.err (!%p3109_p13)
}
 0x25c   : > { %s3113_s10 = scalar_lea.hbm %s4144_s28, 1024  ;;  %s3117_s24 = scalar_lea.hbm %s4197_s4, 2048 }
 0x25d   : > { %p3114_p2 = scmp.ne.s32.totalorder %s4144_s28, %s3113_s10  ;;  %p3118_p0 = scmp.lt.u32.totalorder %s4144_s28, %s4197_s4 }
 0x25e   : > { %p3119_p3 = scmp.lt.u32.totalorder %s3117_s24, %s3113_s10  ;;  %p3121_p9 = scmp.lt.u32.totalorder %s3113_s10, %s4144_s28 }
 0x25f   : > { %p3115_p6 = pnand %p3114_p2, %p3312_p7 }
 0x260   : > { %p3120_p5 = por %p3119_p3, %p3118_p0 }
 0x261   : > { %p3116_p11 = pneg %p3115_p6 }
 0x262   : > { %p3122_p10 = por %p3121_p9, %p3120_p5 }
 0x264   : > { %p3123_p1 = pnand %p3122_p10, %p3116_p11 }
 0x266   : > { %3126 = shalt.err (!%p3123_p1)
}
 0x267   : > { %s3181_s9 = smov 128   ;;  %s3182_s11 = smov 8  }
 0x268   : > { %2940 = dma.vmem_to_hbm [thread:$0]  (%p3312_p7), %s4146_s27, 1024, %s4144_s28, %s2491_s19, %s3181_s9, %s3181_s9, %s3182_s11  }
 0x269 PF: > { %s2519_s30 = sand.u32 1, %s3161_s15   ;;  %p4214_p4 = scmp.ne.s32.totalorder %s4202_s22, 0 }
 0x26a   : > { %p4215_p8 = scmp.ge.s32.totalorder %s3173_s18, 2  ;;  %s2520_s7 = scalar_lea.sflag [#allocation4], %s2519_s30 }
 0x26c   : > { %p2954_p12 = pnand %p4215_p8, %p4214_p4 }
 0x26e   : > { %3156 = dma.done.wait (!%p2954_p12), %s2520_s7, 1024  }
 0x26f   : > { %3158 = vsyncadd (!%p2954_p12), %s2520_s7, 4294966272  ;;  %p19_p13 = scmp.ge.s32.totalorder %s3302_s25, 4   ;;  %s4216_s15 = smov %s3165_s16 }
 0x270   : > { %s4217_s16 = smov %s3169_s17  ;;  %s4218_s17 = smov %s3318_s5 }
 0x271   : > { %s4219_s18 = smov %s3302_s25  ;;  %21 = sbr.rel (!%p19_p13) target bundleno = 7 (0x7), region = 90 }
 0x278   :  { %2525 = vsyncpa [#allocation3], 1 }
 0x279   :  { %2527 = vsyncpa [#allocation3 + $0x1], 1 }
 0x27a   :  { %2528 = vsyncpa [#allocation7], 1 }
 0x27b   :  { %2529 = vsyncpa [#allocation4], 1 }
 0x27c   :  { %2531 = vsyncpa [#allocation4 + $0x1], 1 }
 0x27d   :  { %2532 = vsyncpa [#allocation5], 1 }
 0x27e   :  { %2534 = vsyncpa [#allocation5 + $0x1], 1 }

</bundles_post_ra>
